<compile_context>
chip_gen: v5e
topology: v5e:2x2
jax: 0.10.0
libtpu: 0.0.40
codegen_flags: <defaults>
</compile_context>

<pallas_src>
import functools

import jax
import jax.numpy as jnp
from jax.experimental import pallas as pl
from jax.experimental.pallas import tpu as pltpu

EPS = 1e-5        # nn.SyncBatchNorm eps
LANE = 128


def _round_up(x, m):
    return (x + m - 1) // m * m


# ---------------------------------------------------------------------------
# capability / sizing helpers
# ---------------------------------------------------------------------------
@functools.lru_cache(maxsize=1)
def _single_buffer_supported():
    """Probe whether pipeline_mode=pl.Buffered(1) (single-buffered resident block)
    works with the installed JAX/Mosaic; otherwise keep default double buffering."""
    if not hasattr(pl, "Buffered"):
        return False

    def _probe(x_ref, o_ref):
        o_ref[...] = x_ref[...]

    try:
        pl.pallas_call(
            _probe,
            grid=(2,),
            in_specs=[pl.BlockSpec((8, LANE), lambda i: (0, 0),
                                   pipeline_mode=pl.Buffered(1))],
            out_specs=pl.BlockSpec((8, LANE), lambda i: (0, 0)),
            out_shape=jax.ShapeDtypeStruct((8, LANE), jnp.float32),
        )(jnp.zeros((8, LANE), jnp.float32))
        return True
    except Exception:
        return False


def _maybe_resident_spec(block_shape, index_map, *, resident):
    """BlockSpec; single-buffer it when its block index never changes (saves one
    full VMEM copy of the block -- biggest win on v7x's 64 MiB/TC)."""
    if resident and _single_buffer_supported():
        return pl.BlockSpec(block_shape, index_map, pipeline_mode=pl.Buffered(1))
    return pl.BlockSpec(block_shape, index_map)


def _vmem_limit_bytes():
    """Generation-aware scoped-VMEM request: ~3/4 of physical, capped at 96 MiB
    (v5e/v6e have 128 MiB physical, v7x has 64 MiB per TensorCore)."""
    try:
        cap = getattr(pltpu.get_tpu_info(), "vmem_capacity_bytes", None)
    except Exception:
        cap = None
    if not cap:
        return 48 * 1024 * 1024          # conservative: safe on every generation
    return int(min(cap * 3 // 4, 96 * 1024 * 1024))


def _choose_tiles(m, k_pad, c_pad, budget):
    """Largest (TILE_M, TILE_K) (multiples of 256 rows / 128 lanes) whose phase-1
    working set fits the VMEM budget.  Prefers big M tiles (HBM roofline) and
    an untiled K; falls back to K-tiling for large reductions (v7x)."""
    m_cap = _round_up(m, 256)
    tm_cands = [t for t in (1024, 512, 256) if t <= m_cap]
    tk_cands = [k_pad] + [t for t in (1024, 512, 256, 128)
                          if t < k_pad and k_pad % t == 0]
    for tm in tm_cands:
        for tk in tk_cands:
            w_bufs = 1 if tk == k_pad else 2
            use = (2 * tm * tk * 2            # patches tile (bf16, double-buffered)
                   + w_bufs * tk * c_pad * 2  # weights (bf16)
                   + 2 * tm * c_pad * 2       # bf16 y tile (double-buffered)
                   + tm * c_pad * 4           # f32 accumulator scratch
                   + 2 * 8 * c_pad * 4)       # stats tile
            if use <= budget:
                return tm, tk
    return 256, LANE


def _fused_fits(m_pad, tile_m, k_pad, c_pad, budget):
    use = (4 * m_pad * c_pad * 4         # VMEM-resident f32 y/out + in-kernel temps
           + 2 * tile_m * k_pad * 2      # streamed patches tile
           + 2 * k_pad * c_pad * 2       # weights (conservatively x2)
           + 4 * c_pad * 4)              # gamma / beta
    return use <= budget


# ---------------------------------------------------------------------------
# fused path (small problems): conv + batch stats + normalize + ReLU, one kernel.
# The output block is VMEM-resident across the whole M grid, so the conv output
# never round-trips HBM.
# ---------------------------------------------------------------------------
def fused_conv_bn_relu_kernel(p_ref, w_ref, gamma_ref, beta_ref, o_ref, *,
                              tile_m, m_true):
    i = pl.program_id(0)
    y = jnp.dot(p_ref[...], w_ref[...], preferred_element_type=jnp.float32)
    row0 = pl.multiple_of(i * tile_m, tile_m)
    o_ref[pl.ds(row0, tile_m), :] = y

    @pl.when(i == pl.num_programs(0) - 1)
    def _():
        y_all = o_ref[...]                                   # (M_pad, C_pad) f32
        valid = jax.lax.broadcasted_iota(jnp.int32, y_all.shape, 0) < m_true
        inv_m = 1.0 / m_true
        mean = jnp.sum(jnp.where(valid, y_all, 0.0), axis=0, keepdims=True) * inv_m
        dev = jnp.where(valid, y_all - mean, 0.0)
        var = jnp.sum(dev * dev, axis=0, keepdims=True) * inv_m   # biased (BN)
        scale = gamma_ref[...] * jax.lax.rsqrt(var + EPS)
        shift = beta_ref[...] - mean * scale
        o_ref[...] = jnp.maximum(y_all * scale + shift, 0.0)      # ReLU(ReLU(x)) == ReLU(x)


# ---------------------------------------------------------------------------
# two-phase path, phase 1: K-tiled conv matmul (f32 accumulator) -> bf16 y
#                          + per-M-tile partial BN stats (masking on last tile only)
# ---------------------------------------------------------------------------
def conv_stats_kernel(p_ref, w_ref, y_ref, stats_ref, acc_ref, *, tile_m, m_true):
    i = pl.program_id(0)
    k = pl.program_id(1)
    last_k = k == pl.num_programs(1) - 1
    n_rem = m_true - i * tile_m                     # valid rows in this M tile (>= 1)

    @pl.when(k == 0)
    def _():
        acc_ref[...] = jnp.zeros_like(acc_ref)

    acc_ref[...] += jnp.dot(p_ref[...], w_ref[...],
                            preferred_element_type=jnp.float32)

    def write_stats(tile_sum, tile_m2):
        # stats tile layout (8 sublanes x C lanes): row 0 = sum, row 1 = M2,
        # remaining sublanes zero (keeps the block (8,128)-aligned).
        rows = jax.lax.broadcasted_iota(jnp.int32, stats_ref.shape, 0)
        stats_ref[...] = jnp.where(rows == 0, tile_sum,
                                   jnp.where(rows == 1, tile_m2, 0.0))

    @pl.when(last_k)
    def _():
        y_ref[...] = acc_ref[...].astype(y_ref.dtype)        # bf16 store of conv out

    @pl.when(jnp.logical_and(last_k, n_rem >= tile_m))       # full tiles: unmasked stats
    def _():
        y = acc_ref[...]
        tile_sum = jnp.sum(y, axis=0, keepdims=True)
        dev = y - tile_sum * (1.0 / tile_m)
        write_stats(tile_sum, jnp.sum(dev * dev, axis=0, keepdims=True))

    @pl.when(jnp.logical_and(last_k, n_rem < tile_m))        # only the last, partial tile
    def _():
        y = acc_ref[...]
        rowm = jax.lax.broadcasted_iota(jnp.int32, y.shape, 0) < n_rem
        ym = jnp.where(rowm, y, 0.0)
        tile_sum = jnp.sum(ym, axis=0, keepdims=True)
        dev = jnp.where(rowm, y - tile_sum / n_rem.astype(jnp.float32), 0.0)
        write_stats(tile_sum, jnp.sum(dev * dev, axis=0, keepdims=True))


# ---------------------------------------------------------------------------
# two-phase path, phase 2: streaming normalize + affine + ReLU (bf16 y in, f32 out)
# ---------------------------------------------------------------------------
def bn_relu_kernel(y_ref, scale_ref, shift_ref, o_ref):
    y = y_ref[...].astype(jnp.float32)
    o_ref[...] = jnp.maximum(y * scale_ref[...] + shift_ref[...], 0.0)


# ---------------------------------------------------------------------------
# wrapper
# ---------------------------------------------------------------------------
def conv_module_forward(x_nchw, w_oihw, bias, gamma, beta, padding, *,
                        tile_m=None, tile_k=None, force_two_phase=False):
    """Mirrors ConvModule.forward (training-mode BatchNorm) for NCHW input.

    `bias` is accepted for API parity but never fed to the kernel: training-mode BN
    subtracts the per-channel batch mean, which cancels a constant per-channel bias
    exactly (re-add it if eval-mode / running-stats BN is ever wanted)."""
    del bias
    N, Cin, H, W = x_nchw.shape
    Cout, _, kh, kw = w_oihw.shape

    # ---- glue: NCHW -> NHWC (bf16), pad, im2col in natural (kh*kw, Cin) K order ----
    # TODO(synk): replace the HBM-materialised im2col with an in-kernel halo-DMA conv
    # (kh*kw shifted matmuls) to cut input-side HBM traffic ~kh*kw x for large maps.
    x = jnp.transpose(x_nchw, (0, 2, 3, 1)).astype(jnp.bfloat16)
    x_pad = jnp.pad(x, ((0, 0), (padding, padding), (padding, padding), (0, 0)))
    Ho = H + 2 * padding - kh + 1
    Wo = W + 2 * padding - kw + 1
    slices = [x_pad[:, i:i + Ho, j:j + Wo, :] for i in range(kh) for j in range(kw)]
    patches = jnp.stack(slices, axis=3)              # (N, Ho, Wo, kh*kw, Cin)
    M = N * Ho * Wo
    K = Cin * kh * kw
    patches = patches.reshape(M, K)                  # no extra full-size transpose pass

    # reorder the (tiny) weights once to match the patches' K ordering
    w2 = jnp.transpose(w_oihw, (2, 3, 1, 0)).reshape(K, Cout).astype(jnp.bfloat16)

    K_pad = _round_up(K, LANE)
    C_pad = _round_up(Cout, LANE)

    vmem_limit = _vmem_limit_bytes()
    budget = int(vmem_limit * 0.6)
    tm_auto, tk_auto = _choose_tiles(M, K_pad, C_pad, budget)
    tm = tile_m if tile_m is not None else tm_auto
    tk = tile_k if tile_k is not None else tk_auto
    M_pad = _round_up(M, tm)
    num_m = M_pad // tm
    num_k = K_pad // tk

    patches = jnp.pad(patches, ((0, M_pad - M), (0, K_pad - K)))
    w2 = jnp.pad(w2, ((0, K_pad - K), (0, C_pad - Cout)))
    gamma_p = jnp.pad(gamma.astype(jnp.float32), (0, C_pad - Cout))
    beta_p = jnp.pad(beta.astype(jnp.float32), (0, C_pad - Cout))

    use_fused = ((not force_two_phase) and tk == K_pad
                 and _fused_fits(M_pad, tm, K_pad, C_pad, budget))

    if use_fused:
        # ---- single kernel: y stays VMEM-resident, no HBM round trip ------------
        out = pl.pallas_call(
            functools.partial(fused_conv_bn_relu_kernel, tile_m=tm, m_true=M),
            grid=(num_m,),
            in_specs=[
                pl.BlockSpec((tm, K_pad), lambda i: (i, 0)),
                _maybe_resident_spec((K_pad, C_pad), lambda i: (0, 0), resident=True),
                pl.BlockSpec((1, C_pad), lambda i: (0, 0)),
                pl.BlockSpec((1, C_pad), lambda i: (0, 0)),
            ],
            out_specs=pl.BlockSpec((M_pad, C_pad), lambda i: (0, 0)),
            out_shape=jax.ShapeDtypeStruct((M_pad, C_pad), jnp.float32),
            compiler_params=pltpu.CompilerParams(
                dimension_semantics=("arbitrary",),
                vmem_limit_bytes=vmem_limit),
        )(patches, w2, gamma_p.reshape(1, C_pad), beta_p.reshape(1, C_pad))
    else:
        # ---- phase 1: K-tiled conv matmul + per-tile partial BN stats -----------
        y, stats = pl.pallas_call(
            functools.partial(conv_stats_kernel, tile_m=tm, m_true=M),
            grid=(num_m, num_k),
            in_specs=[
                pl.BlockSpec((tm, tk), lambda i, k: (i, k)),
                _maybe_resident_spec((tk, C_pad), lambda i, k: (k, 0),
                                     resident=(num_k == 1)),
            ],
            out_specs=(
                pl.BlockSpec((tm, C_pad), lambda i, k: (i, 0)),
                pl.BlockSpec((8, C_pad), lambda i, k: (i, 0)),
            ),
            out_shape=(
                jax.ShapeDtypeStruct((M_pad, C_pad), jnp.bfloat16),   # bf16 y
                jax.ShapeDtypeStruct((num_m * 8, C_pad), jnp.float32),
            ),
            scratch_shapes=[pltpu.VMEM((tm, C_pad), jnp.float32)],
            compiler_params=pltpu.CompilerParams(
                dimension_semantics=("parallel", "arbitrary"),
                vmem_limit_bytes=vmem_limit),
        )(patches, w2)

        # ---- glue: Chan combine of per-tile stats -> per-channel scale/shift -----
        stats = stats.reshape(num_m, 8, C_pad)
        tile_sums = stats[:, 0, :]
        tile_m2s = stats[:, 1, :]
        counts = jnp.minimum(M - jnp.arange(num_m) * tm, tm).astype(jnp.float32)
        counts = counts[:, None]
        mean = jnp.sum(tile_sums, axis=0) / M
        tile_means = tile_sums / counts
        m2 = jnp.sum(tile_m2s, axis=0) + jnp.sum(
            counts * (tile_means - mean[None, :]) ** 2, axis=0)
        inv = jax.lax.rsqrt(m2 / M + EPS)                    # biased (BN) variance
        scale = (gamma_p * inv).reshape(1, C_pad)
        shift = (beta_p - mean * gamma_p * inv).reshape(1, C_pad)

        # ---- phase 2: streaming normalize + ReLU ---------------------------------
        # (on v5e, pipeline_mode=pl.Buffered(3) on the y spec can hide DMA startup)
        out = pl.pallas_call(
            bn_relu_kernel,
            grid=(num_m,),
            in_specs=[
                pl.BlockSpec((tm, C_pad), lambda i: (i, 0)),
                pl.BlockSpec((1, C_pad), lambda i: (0, 0)),
                pl.BlockSpec((1, C_pad), lambda i: (0, 0)),
            ],
            out_specs=pl.BlockSpec((tm, C_pad), lambda i: (i, 0)),
            out_shape=jax.ShapeDtypeStruct((M_pad, C_pad), jnp.float32),
            compiler_params=pltpu.CompilerParams(
                dimension_semantics=("parallel",),
                vmem_limit_bytes=vmem_limit),
        )(y, scale, shift)

    out = out[:M, :Cout].reshape(N, Ho, Wo, Cout)
    return jnp.transpose(out, (0, 3, 1, 2))                  # (N, Cout, Ho, Wo)


# ---------------------------------------------------------------------------
# pure-JAX reference (conv + bias + train-mode BN + ReLU)
# ---------------------------------------------------------------------------
def _reference(x_nchw, w_oihw, bias, gamma, beta, padding):
    y = jax.lax.conv_general_dilated(
        x_nchw, w_oihw, window_strides=(1, 1),
        padding=[(padding, padding), (padding, padding)],
        dimension_numbers=("NCHW", "OIHW", "NCHW"),
    ) + bias[None, :, None, None]
    mean = y.mean(axis=(0, 2, 3), keepdims=True)
    var = y.var(axis=(0, 2, 3), keepdims=True)     # biased, matches BN normalization
    y = (y - mean) * jax.lax.rsqrt(var + EPS)
    y = y * gamma[None, :, None, None] + beta[None, :, None, None]
    return jnp.maximum(y, 0.0)


if __name__ == "__main__":
    def make_case(key, N, Cin, H, W, Cout, ksize, padding):
        k1, k2, k3, k4, k5 = jax.random.split(key, 5)
        x = jax.random.normal(k1, (N, Cin, H, W), jnp.float32)
        fan_in = Cin * ksize * ksize
        w = jax.random.normal(k2, (Cout, Cin, ksize, ksize), jnp.float32) / jnp.sqrt(fan_in)
        b = 0.05 * jax.random.normal(k3, (Cout,), jnp.float32)
        gamma = 1.0 + 0.1 * jax.random.normal(k4, (Cout,), jnp.float32)
        beta = 0.1 * jax.random.normal(k5, (Cout,), jnp.float32)
        # the kernel feeds the MXU bf16 operands; round here so the f32 reference
        # sees the same operand values (bf16*bf16 products are then exact in f32)
        x = x.astype(jnp.bfloat16).astype(jnp.float32)
        w = w.astype(jnp.bfloat16).astype(jnp.float32)
        return x, w, b, gamma, beta, padding

    k0, k1 = jax.random.split(jax.random.PRNGKey(0))

    # case 1: module-spec shapes; fused single-pass path (y never round-trips HBM)
    x, w, b, g, bt, pad = make_case(k0, 2, 4, 16, 16, 8, 3, 1)
    out = jax.block_until_ready(conv_module_forward(x, w, b, g, bt, pad, tile_m=256))
    ref = _reference(x, w, b, g, bt, pad)
    assert out.shape == ref.shape == (2, 8, 16, 16)
    assert jnp.allclose(out, ref, atol=1e-3, rtol=1e-3), "fused path mismatch"

    # case 2: same inputs through the general two-phase path (bf16 y intermediate).
    # Tolerance sized to bf16 storage of y: roundoff 2^-8 x max standardized
    # activation (~4-5 sigma) x gamma  =>  ~2e-2 worst case.
    out2 = jax.block_until_ready(conv_module_forward(
        x, w, b, g, bt, pad, tile_m=256, force_two_phase=True))
    assert jnp.allclose(out2, ref, atol=4e-2, rtol=4e-2), "two-phase path mismatch"

    # case 3: partial last M tile (masked stats branch) + K-tiled accumulator path
    x3, w3, b3, g3, bt3, pad3 = make_case(k1, 2, 16, 10, 10, 8, 3, 1)
    out3 = jax.block_until_ready(conv_module_forward(
        x3, w3, b3, g3, bt3, pad3, tile_m=256, tile_k=128, force_two_phase=True))
    ref3 = _reference(x3, w3, b3, g3, bt3, pad3)
    assert out3.shape == ref3.shape == (2, 8, 10, 10)
    assert jnp.allclose(out3, ref3, atol=4e-2, rtol=4e-2), "K-tiled path mismatch"

    print("KERNEL_OK")
</pallas_src>

<mosaic_0001>
module attributes {stable_mosaic.version = 11 : i64} {
  func.func @_probe(%arg0: i32, %arg1: memref<8x128xf32, #tpu.memory_space<vmem>>, %arg2: memref<8x128xf32, #tpu.memory_space<vmem>>) attributes {dimension_semantics = [#tpu.dimension_semantics<arbitrary>], iteration_bounds = array<i64: 2>, scalar_prefetch = 0 : i64, scratch_operands = 0 : i64, tpu.core_type = #tpu.core_type<tc>, window_params = [{pipeline_mode = #tpu.pipeline_mode<synchronous>, transform_indices = @transform_0, window_bounds = array<i64: 8, 128>}, {pipeline_mode = #tpu.pipeline_mode<synchronous>, transform_indices = @transform_1, window_bounds = array<i64: 8, 128>}]} {
    %c0 = arith.constant 0 : index
    %c0_0 = arith.constant 0 : index
    %0 = vector.load %arg1[%c0, %c0_0] : memref<8x128xf32, #tpu.memory_space<vmem>>, vector<8x128xf32>
    %c0_1 = arith.constant 0 : index
    %c0_2 = arith.constant 0 : index
    %1 = vector.load %arg2[%c0_1, %c0_2] : memref<8x128xf32, #tpu.memory_space<vmem>>, vector<8x128xf32>
    tpu.vector_store %arg2[%c0_1, %c0_2], %0 {strides = array<i32>} : memref<8x128xf32, #tpu.memory_space<vmem>>, vector<8x128xf32>,
    return
  }
  func.func @transform_0(%arg0: i32) -> (i32, i32) {
    %c0_i32 = arith.constant 0 : i32
    %c0_i32_0 = arith.constant 0 : i32
    %c0_i32_1 = arith.constant 0 : i32
    return %c0_i32, %c0_i32_0 : i32, i32
  }
  func.func @transform_1(%arg0: i32) -> (i32, i32) {
    %c0_i32 = arith.constant 0 : i32
    %c0_i32_0 = arith.constant 0 : i32
    %c0_i32_1 = arith.constant 0 : i32
    return %c0_i32, %c0_i32_0 : i32, i32
  }
}

module attributes {stable_mosaic.version = 11 : i64} {
  func.func @fused_conv_bn_relu_kernel(%arg0: i32, %arg1: memref<256x128xbf16, #tpu.memory_space<vmem>>, %arg2: memref<128x128xbf16, #tpu.memory_space<vmem>>, %arg3: memref<1x128xf32, #tpu.memory_space<vmem>>, %arg4: memref<1x128xf32, #tpu.memory_space<vmem>>, %arg5: memref<512x128xf32, #tpu.memory_space<vmem>>) attributes {dimension_semantics = [#tpu.dimension_semantics<arbitrary>], iteration_bounds = array<i64: 2>, scalar_prefetch = 0 : i64, scratch_operands = 0 : i64, tpu.core_type = #tpu.core_type<tc>, window_params = [{transform_indices = @transform_0, window_bounds = array<i64: 256, 128>}, {pipeline_mode = #tpu.pipeline_mode<synchronous>, transform_indices = @transform_1, window_bounds = array<i64: 128, 128>}, {pipeline_mode = #tpu.pipeline_mode<synchronous>, transform_indices = @transform_2, window_bounds = array<i64: 1, 128>}, {pipeline_mode = #tpu.pipeline_mode<synchronous>, transform_indices = @transform_3, window_bounds = array<i64: 1, 128>}, {pipeline_mode = #tpu.pipeline_mode<synchronous>, transform_indices = @transform_4, window_bounds = array<i64: 512, 128>}]} {
    %c0 = arith.constant 0 : index
    %c0_0 = arith.constant 0 : index
    %0 = vector.load %arg1[%c0, %c0_0] : memref<256x128xbf16, #tpu.memory_space<vmem>>, vector<256x128xbf16>
    %c0_1 = arith.constant 0 : index
    %c0_2 = arith.constant 0 : index
    %1 = vector.load %arg2[%c0_1, %c0_2] : memref<128x128xbf16, #tpu.memory_space<vmem>>, vector<128x128xbf16>
    %cst = arith.constant dense<0.000000e+00> : vector<256x128xf32>
    %2 = tpu.matmul %0, %1, %cst {dimension_numbers = #tpu.dot_dimension_numbers<[1], [0], [0], [1], [0, 0, 1, 1], [], []>} : vector<256x128xbf16>, vector<128x128xbf16>, vector<256x128xf32> -> vector<256x128xf32>
    %c256_i32 = arith.constant 256 : i32
    %3 = arith.muli %arg0, %c256_i32 : i32
    %4 = tpu.assume_multiple %3, 256 : i32
    %5 = arith.index_cast %4 : i32 to index
    %c0_3 = arith.constant 0 : index
    %6 = vector.load %arg5[%5, %c0_3] : memref<512x128xf32, #tpu.memory_space<vmem>>, vector<256x128xf32>
    tpu.vector_store %arg5[%5, %c0_3], %2 {strides = array<i32>} : memref<512x128xf32, #tpu.memory_space<vmem>>, vector<256x128xf32>,
    %c1_i32 = arith.constant 1 : i32
    %7 = arith.cmpi eq, %arg0, %c1_i32 : i32
    %8 = arith.extui %7 : i1 to i32
    %c0_i32 = arith.constant 0 : i32
    %9 = arith.cmpi ne, %8, %c0_i32 : i32
    scf.if %9 {
      %c0_4 = arith.constant 0 : index
      %c0_5 = arith.constant 0 : index
      %10 = vector.load %arg5[%c0_4, %c0_5] : memref<512x128xf32, #tpu.memory_space<vmem>>, vector<512x128xf32>
      %11 = tpu.iota {dimensions = array<i32: 0>} : vector<512x128xi32>
      %c512_i32 = arith.constant 512 : i32
      %12 = vector.broadcast %c512_i32 : i32 to vector<512x128xi32>
      %13 = arith.cmpi slt, %11, %12 : vector<512x128xi32>
      %cst_6 = arith.constant 0.000000e+00 : f32
      %14 = vector.broadcast %cst_6 : f32 to vector<512x128xf32>
      %15 = arith.select %13, %10, %14 : vector<512x128xi1>, vector<512x128xf32>
      %cst_7 = arith.constant dense<0.000000e+00> : vector<128xf32>
      %16 = vector.multi_reduction <add>, %15, %cst_7 [0] : vector<512x128xf32> to vector<128xf32>
      %17 = vector.shape_cast %16 : vector<128xf32> to vector<1x128xf32>
      %cst_8 = arith.constant 0.001953125 : f32
      %18 = vector.broadcast %cst_8 : f32 to vector<1x128xf32>
      %19 = arith.mulf %17, %18 : vector<1x128xf32>
      %20 = vector.broadcast %19 : vector<1x128xf32> to vector<512x128xf32>
      %21 = arith.subf %10, %20 : vector<512x128xf32>
      %cst_9 = arith.constant 0.000000e+00 : f32
      %22 = vector.broadcast %cst_9 : f32 to vector<512x128xf32>
      %23 = arith.select %13, %21, %22 : vector<512x128xi1>, vector<512x128xf32>
      %24 = arith.mulf %23, %23 : vector<512x128xf32>
      %cst_10 = arith.constant dense<0.000000e+00> : vector<128xf32>
      %25 = vector.multi_reduction <add>, %24, %cst_10 [0] : vector<512x128xf32> to vector<128xf32>
      %26 = vector.shape_cast %25 : vector<128xf32> to vector<1x128xf32>
      %cst_11 = arith.constant 0.001953125 : f32
      %27 = vector.broadcast %cst_11 : f32 to vector<1x128xf32>
      %28 = arith.mulf %26, %27 : vector<1x128xf32>
      %c0_12 = arith.constant 0 : index
      %c0_13 = arith.constant 0 : index
      %29 = vector.load %arg3[%c0_12, %c0_13] : memref<1x128xf32, #tpu.memory_space<vmem>>, vector<1x128xf32>
      %cst_14 = arith.constant 9.99999974E-6 : f32
      %30 = vector.broadcast %cst_14 : f32 to vector<1x128xf32>
      %31 = arith.addf %28, %30 : vector<1x128xf32>
      %32 = math.rsqrt %31 : vector<1x128xf32>
      %33 = arith.mulf %29, %32 : vector<1x128xf32>
      %c0_15 = arith.constant 0 : index
      %c0_16 = arith.constant 0 : index
      %34 = vector.load %arg4[%c0_15, %c0_16] : memref<1x128xf32, #tpu.memory_space<vmem>>, vector<1x128xf32>
      %35 = arith.mulf %19, %33 : vector<1x128xf32>
      %36 = arith.subf %34, %35 : vector<1x128xf32>
      %37 = vector.broadcast %33 : vector<1x128xf32> to vector<512x128xf32>
      %38 = arith.mulf %10, %37 : vector<512x128xf32>
      %39 = vector.broadcast %36 : vector<1x128xf32> to vector<512x128xf32>
      %40 = arith.addf %38, %39 : vector<512x128xf32>
      %cst_17 = arith.constant 0.000000e+00 : f32
      %41 = vector.broadcast %cst_17 : f32 to vector<512x128xf32>
      %42 = arith.maximumf %40, %41 : vector<512x128xf32>
      %c0_18 = arith.constant 0 : index
      %c0_19 = arith.constant 0 : index
      %43 = vector.load %arg5[%c0_18, %c0_19] : memref<512x128xf32, #tpu.memory_space<vmem>>, vector<512x128xf32>
      tpu.vector_store %arg5[%c0_18, %c0_19], %42 {strides = array<i32>} : memref<512x128xf32, #tpu.memory_space<vmem>>, vector<512x128xf32>,
    } else {
    }
    return
  }
  func.func @transform_0(%arg0: i32) -> (i32, i32) {
    %c0_i32 = arith.constant 0 : i32
    %c0_i32_0 = arith.constant 0 : i32
    return %arg0, %c0_i32 : i32, i32
  }
  func.func @transform_1(%arg0: i32) -> (i32, i32) {
    %c0_i32 = arith.constant 0 : i32
    %c0_i32_0 = arith.constant 0 : i32
    %c0_i32_1 = arith.constant 0 : i32
    return %c0_i32, %c0_i32_0 : i32, i32
  }
  func.func @transform_2(%arg0: i32) -> (i32, i32) {
    %c0_i32 = arith.constant 0 : i32
    %c0_i32_0 = arith.constant 0 : i32
    %c0_i32_1 = arith.constant 0 : i32
    return %c0_i32, %c0_i32_0 : i32, i32
  }
  func.func @transform_3(%arg0: i32) -> (i32, i32) {
    %c0_i32 = arith.constant 0 : i32
    %c0_i32_0 = arith.constant 0 : i32
    %c0_i32_1 = arith.constant 0 : i32
    return %c0_i32, %c0_i32_0 : i32, i32
  }
  func.func @transform_4(%arg0: i32) -> (i32, i32) {
    %c0_i32 = arith.constant 0 : i32
    %c0_i32_0 = arith.constant 0 : i32
    %c0_i32_1 = arith.constant 0 : i32
    return %c0_i32, %c0_i32_0 : i32, i32
  }
}

</mosaic_0001>

<bundles_post_ra>
// kernel: tpu_custom_call.1
= control target key start
LH: loop header
LB: loop body
LE: loop exit
PB: predicated region body
PF: predicated region fallthrough
CT: control target
= control target key end

     0   :  { %6 = vsyncpa [#allocation3], 0  ;;  %s286_s0 = inlined_call_operand.hbm [shape: f32[8,128], index: 0, kind: input, shape index: {}]   ;;  %s287_s1 = inlined_call_operand.hbm [shape: f32[8,128], index: 1, kind: output, shape index: {}]  }
   0x1   :  { %7 = vsyncpa [#allocation4], 0  ;;  %s269_s6 = smov 0  }
   0x2 LB: > { %s148_s7 = sadd.s32 4294967295, %s255_s6   ;;  %p149_p0 = scmp.ge.s32.totalorder %s255_s6, 1  ;;  %s255_s6 = sphi %s269_s6, %s13_s6  }
   0x3   : > { %p60_p1 = scmp.lt.s32.totalorder %s255_s6, 3  ;;  %s72_s10 = sshll.u32 %s286_s0, 4  ;;  %s73_s10 = int_to_ptr.hbm [resolvable:$true] %s72_s10 }
   0x4   : > { %p169_p3 = scmp.eq.s32.totalorder %s148_s7, 0  ;;  %s257_s11 = smov [#allocation2]  }
   0x5   : > { %p61_p2 = pnand %p149_p0, %p60_p1  ;;  %s74_s12 = sshll.u32 %s257_s11, 4  ;;  %s75_s12 = int_to_ptr.vmem [resolvable:$true] %s74_s12 }
   0x7   : > { %p165_p4 = pneg %p61_p2  ;;  %87 = sbr.rel (%p61_p2) target bundleno = 19 (0x13), region = 24 }
   0x9   : > { %p166_p5 = pnand %p169_p3, %p165_p4 }
   0xb   : > { %168 = dma.hbm_to_vmem [thread:$0]  (!%p166_p5), %s73_s10, 128, %s75_s12, [#allocation3]  }
   0xc   : > { %246 = dma.done.wait (%p169_p3), [#allocation3], 128  }
   0xd   : > { %248 = vsyncadd (%p169_p3), [#allocation3], 4294967168  ;;  %s258_s13 = smov [#allocation5]   ;;  %s108_s17 = sshll.u32 %s287_s1, 4  ;;  %v98_v0 = vld [vmem:[#allocation2] sm:$0xff]  ;;  %s109_s17 = int_to_ptr.hbm [resolvable:$true] %s108_s17 }
   0xe   : > { %s106_s14 = sshll.u32 %s258_s13, 4  ;;  %p171_p6 = scmp.eq.s32.totalorder %s148_s7, 1  ;;  %99 = vst [vmem:[#allocation5] sm:$0xff] %v98_v0  ;;  %s107_s14 = int_to_ptr.vmem [resolvable:$true] %s106_s14 }
  0x10   : > { %162 = dma.vmem_to_hbm [thread:$0]  (%p171_p6), %s107_s14, 128, %s109_s17, [#allocation4]  }
  0x11   : > { %250 = dma.done.wait (%p171_p6), [#allocation4], 128  }
  0x12   : > { %252 = vsyncadd (%p171_p6), [#allocation4], 4294967168 }
  0x13 PF: > { %s13_s6 = sadd.s32 1, %s255_s6  }
  0x14   : > { %p10_p7 = scmp.ge.s32.totalorder %s13_s6, 4  }
  0x16   :  { %12 = sbr.rel (!%p10_p7) target bundleno = 2 (0x2), region = 53 }
  0x1b   :  { %122 = vsyncpa [#allocation3], 1 }
  0x1c   :  { %124 = vsyncpa [#allocation3 + $0x1], 1 }
  0x1d   :  { %125 = vsyncpa [#allocation4], 1 }
  0x1e   :  { %127 = vsyncpa [#allocation4 + $0x1], 1 }

// kernel: tpu_custom_call.1
= control target key start
LH: loop header
LB: loop body
LE: loop exit
PB: predicated region body
PF: predicated region fallthrough
CT: control target
= control target key end

     0   :  { %9 = vsyncpa [#allocation3], 0  ;;  %s2560_s0 = inlined_call_operand.hbm [shape: bf16[512,128], index: 0, kind: input, shape index: {}]   ;;  %s2561_s1 = inlined_call_operand.hbm [shape: bf16[128,128], index: 1, kind: input, shape index: {}]   ;;  %s2562_s2 = inlined_call_operand.vmem [shape: f32[1,128], index: 2, kind: input, shape index: {}]   ;;  %s2563_s3 = inlined_call_operand.vmem [shape: f32[1,128], index: 3, kind: input, shape index: {}]   ;;  %s2564_s4 = inlined_call_operand.hbm [shape: f32[512,128], index: 4, kind: output, shape index: {}]  }
   0x1   :  { %11 = vsyncpa [#allocation3 + $0x1], 0 }
   0x2   :  { %12 = vsyncpa [#allocation6], 0 }
   0x3   :  { %13 = vsyncpa [#allocation4], 0  ;;  %s1870_s15 = smov 0   ;;  %s1872_s16 = smov 0  }
   0x4   :  { %s1874_s17 = smov 0   ;;  %s1876_s18 = smov 0  }
   0x5 LB: > { %s1889_s19 = sadd.s32 4294967295, %s1837_s18   ;;  %p39_p0 = scmp.ne.s32.totalorder %s1829_s16, %s1825_s15  ;;  %s1837_s18 = sphi %s1876_s18, %s2675_s18   ;;  %s1833_s17 = sphi %s1874_s17, %s2674_s17   ;;  %s1829_s16 = sphi %s1872_s16, %s2673_s16   ;;  %s1825_s15 = sphi %s1870_s15, %s2672_s15  }
   0x6   : > { %p40_p1 = scmp.eq.s32.totalorder %s1889_s19, 0  ;;  %p1484_p2 = scmp.ge.s32.totalorder %s1837_s18, 1 }
   0x7   : > { %p134_p3 = scmp.lt.s32.totalorder %s1837_s18, 3  ;;  %s145_s23 = sshll.u32 %s2561_s1, 4  ;;  %s146_s23 = int_to_ptr.hbm [resolvable:$true] %s145_s23 }
   0x8   : > { %p1897_p4 = por %p40_p1, %p39_p0  ;;  %s1839_s25 = smov [#allocation5]  }
   0x9   : > { %p1904_p5 = pnand %p1484_p2, %p134_p3  ;;  %s147_s26 = sshll.u32 %s1839_s25, 4  ;;  %s148_s26 = int_to_ptr.vmem [resolvable:$true] %s147_s26 }
   0xa   : > { %s1913_s27 = sadd.s32 1, %s1837_s18   ;;  %s1840_s28 = smov 64  }
   0xb   : > { %p1654_p6 = pneg %p1904_p5  ;;  %s1841_s29 = smov 4  }
   0xc   : > { %s23_s30 = ssub.s32 %s1837_s18, %s1913_s27  ;;  %s26_s5 = sadd.s32 1, %s1833_s17 }
   0xd   : > { %p1655_p7 = pnand %p1654_p6, %p40_p1  ;;  %p24_p8 = scmp.eq.s32.totalorder %s23_s30, 0 }
   0xe   : > { %p33_p9 = scmp.ne.s32.totalorder %s1833_s17, %s1829_s16  ;;  %p34_p10 = scmp.eq.s32.totalorder %s1837_s18, 0 }
   0xf   : > { %1657 = dma.hbm_to_vmem [thread:$0]  (!%p1655_p7), %s146_s23, 1024, %s148_s26, [#allocation6], %s1840_s28, %s1840_s28, %s1841_s29  }
  0x10   : > { %p1663_p11 = scmp.lt.s32.totalorder %s1837_s18, 2  ;;  %p35_p12 = por %p34_p10, %p33_p9 }
  0x11   : > { %s1926_s6 = scalar_select %p24_p8, %s1833_s17, %s26_s5  }
  0x12   : > { %s167_s7 = sand.u32 1, %s1833_s17   ;;  %s1595_s9 = sshll.u32 %s1837_s18, 7 }
  0x13   : > { %s1487_s8 = sshll.u32 %s167_s7, 7  ;;  %s176_s12 = scalar_lea.hbm %s2560_s0, %s1595_s9 }
  0x14   : > { %s171_s13 = scalar_lea.vmem [#allocation2], %s1487_s8  ;;  %s177_s15 = sshll.u32 %s176_s12, 4  ;;  %s178_s15 = int_to_ptr.hbm [resolvable:$true] %s177_s15 }
  0x15   : > { %s179_s14 = sshll.u32 %s171_s13, 4  ;;  %p1933_p13 = pnand %p1663_p11, %p35_p12  ;;  %s180_s14 = int_to_ptr.vmem [resolvable:$true] %s179_s14 }
  0x16   : > { %s168_s22 = scalar_lea.sflag [#allocation3], %s167_s7  ;;  %s1737_s23 = sshra.s32 %s178_s15, 4  ;;  %s1738_s23 = int_to_ptr.hbm [resolvable:$true] %s1737_s23 }
  0x17   : > { %s1739_s25 = scalar_lea.hbm %s1738_s23, 128  ;;  %p1741_p2 = pneg %p1933_p13 }
  0x18   : > { %p1740_p0 = scmp.ne.s32.totalorder %s1738_s23, %s1739_s25  ;;  %s1744_s30 = scalar_lea.hbm %s2560_s0, 256 }
  0x19   : > { %p1745_p7 = scmp.lt.s32.totalorder %s1738_s23, %s2560_s0  ;;  %p1746_p8 = scmp.lt.s32.totalorder %s1744_s30, %s1739_s25 }
  0x1a   : > { %p1742_p3 = pnand %p1741_p2, %p1740_p0 }
  0x1b   : > { %p1747_p9 = por %p1746_p8, %p1745_p7 }
  0x1c   : > { %p1743_p6 = pneg %p1742_p3 }
  0x1e   : > { %p1748_p10 = pnand %p1747_p9, %p1743_p6 }
  0x20   : > { %1751 = shalt.err (!%p1748_p10)
}
  0x21   : > { %1661 = dma.hbm_to_vmem [thread:$0]  (!%p1933_p13), %s178_s15, 2048, %s180_s14, %s168_s22, %s1840_s28, %s1840_s28, %s1841_s29  }
  0x22   : > { %191 = sbr.rel (%p1904_p5) target bundleno = 658 (0x292), region = 36  ;;  %s193_s7 = sand.u32 (!%p1904_p5), 1, %s1829_s16  }
  0x23   : > { %s1491_s9 = sshll.u32 (!%p1904_p5), %s193_s7, 7  ;;  %s194_s10 = scalar_lea.sflag (!%p1904_p5), [#allocation3], %s193_s7 }
  0x24   : > { %s1953_s11 = scalar_lea.vmem (!%p1904_p5), [#allocation2], %s1491_s9 }
  0x27   : > { %1812 = dma.done.wait (%p1897_p4), %s194_s10, 2048  }
  0x28   : > { %1814 = vsyncadd (%p1897_p4), %s194_s10, 4294965248 }
  0x29   : > { %1816 = dma.done.wait (%p40_p1), [#allocation6], 1024  }
  0x2a   : > { %1818 = vsyncadd (%p40_p1), [#allocation6], 4294966272  ;;  %v1619_v0 = vld [vmem:[#allocation5 + $0x38] sm:$0xff]  ;;  %v1618_v1 = vld [vmem:[#allocation5 + $0x30] sm:$0xff]  ;;  %s1589_s20 = sshll.u32 %s1889_s19, 8  ;;  %p1590_p1 = scmp.ne.s32.totalorder %s1889_s19, 1 }
  0x2b   : > { %416 = vmatpush.bf16.msra.mxu0 %v1619_v0  ;;  %1620 = vmatpush.bf16.msra.mxu1 %v1619_v0  ;;  %v1617_v2 = vld [vmem:[#allocation5 + $0x28] sm:$0xff]  ;;  %v1616_v3 = vld [vmem:[#allocation5 + $0x20] sm:$0xff]  ;;  %v1615_v4 = vld [vmem:[#allocation5 + $0x18] sm:$0xff]  ;;  %s1980_s24 = scalar_lea.vmem [#allocation7], %s1589_s20 }
  0x2c   : > { %1621 = vmatpush.bf16.msra.mxu2 %v1619_v0  ;;  %1622 = vmatpush.bf16.msra.mxu3 %v1619_v0  ;;  %v1614_v5 = vld [vmem:[#allocation5 + $0x10] sm:$0xff]  ;;  %v1613_v6 = vld [vmem:[#allocation5 + $0x8] sm:$0xff]  ;;  %v1612_v7 = vld [vmem:[#allocation5] sm:$0xff] }
  0x2d   : > { %v1596_v8 = vld [vmem:[%s1953_s11] sm:$0xff]  ;;  %v1597_v12 = vld [vmem:[%s1953_s11 + $0x8] sm:$0xff]  ;;  %v1598_v16 = vld [vmem:[%s1953_s11 + $0x10] sm:$0xff] }
  0x2e   : > { %v1600_v9 = vld [vmem:[%s1953_s11 + $0x20] sm:$0xff]  ;;  %v1601_v13 = vld [vmem:[%s1953_s11 + $0x28] sm:$0xff]  ;;  %v1602_v17 = vld [vmem:[%s1953_s11 + $0x30] sm:$0xff] }
  0x2f   : > { %417 = vmatpush.bf16.msra.mxu0 %v1618_v1  ;;  %1623 = vmatpush.bf16.msra.mxu1 %v1618_v1  ;;  %v1604_v10 = vld [vmem:[%s1953_s11 + $0x40] sm:$0xff]  ;;  %v1605_v14 = vld [vmem:[%s1953_s11 + $0x48] sm:$0xff]  ;;  %v1606_v18 = vld [vmem:[%s1953_s11 + $0x50] sm:$0xff] }
  0x30   : > { %1624 = vmatpush.bf16.msra.mxu2 %v1618_v1  ;;  %1625 = vmatpush.bf16.msra.mxu3 %v1618_v1  ;;  %v1608_v11 = vld [vmem:[%s1953_s11 + $0x60] sm:$0xff]  ;;  %v1609_v15 = vld [vmem:[%s1953_s11 + $0x68] sm:$0xff]  ;;  %v1610_v19 = vld [vmem:[%s1953_s11 + $0x70] sm:$0xff] }
  0x31   : > { %v1599_v20 = vld [vmem:[%s1953_s11 + $0x18] sm:$0xff] }
  0x32   : > { %v1603_v21 = vld [vmem:[%s1953_s11 + $0x38] sm:$0xff] }
  0x33   : > { %418 = vmatpush.bf16.msra.mxu0 %v1617_v2  ;;  %1626 = vmatpush.bf16.msra.mxu1 %v1617_v2  ;;  %v1607_v22 = vld [vmem:[%s1953_s11 + $0x58] sm:$0xff] }
  0x34   : > { %1627 = vmatpush.bf16.msra.mxu2 %v1617_v2  ;;  %1628 = vmatpush.bf16.msra.mxu3 %v1617_v2  ;;  %v1611_v23 = vld [vmem:[%s1953_s11 + $0x78] sm:$0xff] }
  0x37   : > { %419 = vmatpush.bf16.msra.mxu0 %v1616_v3  ;;  %1629 = vmatpush.bf16.msra.mxu1 %v1616_v3 }
  0x38   : > { %1630 = vmatpush.bf16.msra.mxu2 %v1616_v3  ;;  %1631 = vmatpush.bf16.msra.mxu3 %v1616_v3 }
  0x3b   : > { %420 = vmatpush.bf16.msra.mxu0 %v1615_v4  ;;  %1632 = vmatpush.bf16.msra.mxu1 %v1615_v4 }
  0x3c   : > { %1633 = vmatpush.bf16.msra.mxu2 %v1615_v4  ;;  %1634 = vmatpush.bf16.msra.mxu3 %v1615_v4 }
  0x3f   : > { %421 = vmatpush.bf16.msra.mxu0 %v1614_v5  ;;  %1635 = vmatpush.bf16.msra.mxu1 %v1614_v5 }
  0x40   : > { %1636 = vmatpush.bf16.msra.mxu2 %v1614_v5  ;;  %1637 = vmatpush.bf16.msra.mxu3 %v1614_v5 }
  0x43   : > { %422 = vmatpush.bf16.msra.mxu0 %v1613_v6  ;;  %1638 = vmatpush.bf16.msra.mxu1 %v1613_v6 }
  0x44   : > { %1639 = vmatpush.bf16.msra.mxu2 %v1613_v6  ;;  %1640 = vmatpush.bf16.msra.mxu3 %v1613_v6 }
  0x47   : > { %423 = vmatpush.bf16.msra.mxu0 %v1612_v7  ;;  %1641 = vmatpush.bf16.msra.mxu1 %v1612_v7 }
  0x48   : > { %1642 = vmatpush.bf16.msra.mxu2 %v1612_v7  ;;  %1643 = vmatpush.bf16.msra.mxu3 %v1612_v7 }
  0x4a   : > { %424 = vmatmul.bf16.vlgmr.msra.gmra.mxu0 %v1596_v8  ;;  %444 = vmatmul.bf16.vlgmr.msra.gmra.mxu1 %v1600_v9 }
  0x4b   : > { %464 = vmatmul.bf16.vlgmr.msra.gmra.mxu2 %v1604_v10  ;;  %484 = vmatmul.bf16.vlgmr.msra.gmra.mxu3 %v1608_v11 }
  0x5a   : > { %429 = vmatmul.bf16.gmra.mxu0 %v1597_v12  ;;  %449 = vmatmul.bf16.gmra.mxu1 %v1601_v13 }
  0x5b   : > { %469 = vmatmul.bf16.gmra.mxu2 %v1605_v14  ;;  %489 = vmatmul.bf16.gmra.mxu3 %v1609_v15 }
  0x6a   : > { %434 = vmatmul.bf16.gmra.mxu0 %v1598_v16  ;;  %454 = vmatmul.bf16.gmra.mxu1 %v1602_v17 }
  0x6b   : > { %474 = vmatmul.bf16.gmra.mxu2 %v1606_v18  ;;  %494 = vmatmul.bf16.gmra.mxu3 %v1610_v19 }
  0x7a   : > { %439 = vmatmul.bf16.gmra.mxu0 %v1599_v20  ;;  %459 = vmatmul.bf16.gmra.mxu1 %v1603_v21 }
  0x7b   : > { %479 = vmatmul.bf16.gmra.mxu2 %v1607_v22  ;;  %499 = vmatmul.bf16.gmra.mxu3 %v1611_v23 }
  0xc7   : > { %v425_v24 = vpop.f32.mrf.mxu0  ;;  %v445_v25 = vpop.f32.mrf.mxu1 }
  0xc8   : > { %507 = vst [vmem:[%s1980_s24] sm:$0xff] %v425_v24 }
  0xc9   : > { %515 = vst [vmem:[%s1980_s24 + $0x40] sm:$0xff] %v445_v25 }
  0xce   : > { %v465_v26 = vpop.f32.mrf.mxu2  ;;  %v485_v27 = vpop.f32.mrf.mxu3 }
  0xcf   : > { %523 = vst [vmem:[%s1980_s24 + $0x80] sm:$0xff] %v465_v26  ;;  %v427_v28 = vpop.f32.mrf.mxu0  ;;  %v447_v29 = vpop.f32.mrf.mxu1 }
  0xd0   : > { %531 = vst [vmem:[%s1980_s24 + $0xc0] sm:$0xff] %v485_v27 }
  0xd1   : > { %508 = vst [vmem:[%s1980_s24 + $0x8] sm:$0xff] %v427_v28 }
  0xd2   : > { %516 = vst [vmem:[%s1980_s24 + $0x48] sm:$0xff] %v447_v29 }
  0xd6   : > { %v467_v30 = vpop.f32.mrf.mxu2  ;;  %v487_v31 = vpop.f32.mrf.mxu3 }
  0xd7   : > { %524 = vst [vmem:[%s1980_s24 + $0x88] sm:$0xff] %v467_v30  ;;  %v430_v32 = vpop.f32.mrf.mxu0  ;;  %v450_v33 = vpop.f32.mrf.mxu1 }
  0xd8   : > { %532 = vst [vmem:[%s1980_s24 + $0xc8] sm:$0xff] %v487_v31 }
  0xd9   : > { %509 = vst [vmem:[%s1980_s24 + $0x10] sm:$0xff] %v430_v32 }
  0xda   : > { %517 = vst [vmem:[%s1980_s24 + $0x50] sm:$0xff] %v450_v33 }
  0xde   : > { %v470_v34 = vpop.f32.mrf.mxu2  ;;  %v490_v35 = vpop.f32.mrf.mxu3 }
  0xdf   : > { %525 = vst [vmem:[%s1980_s24 + $0x90] sm:$0xff] %v470_v34  ;;  %v432_v36 = vpop.f32.mrf.mxu0  ;;  %v452_v37 = vpop.f32.mrf.mxu1 }
  0xe0   : > { %533 = vst [vmem:[%s1980_s24 + $0xd0] sm:$0xff] %v490_v35 }
  0xe1   : > { %510 = vst [vmem:[%s1980_s24 + $0x18] sm:$0xff] %v432_v36 }
  0xe2   : > { %518 = vst [vmem:[%s1980_s24 + $0x58] sm:$0xff] %v452_v37 }
  0xe6   : > { %v472_v38 = vpop.f32.mrf.mxu2  ;;  %v492_v39 = vpop.f32.mrf.mxu3 }
  0xe7   : > { %526 = vst [vmem:[%s1980_s24 + $0x98] sm:$0xff] %v472_v38  ;;  %v435_v40 = vpop.f32.mrf.mxu0  ;;  %v455_v41 = vpop.f32.mrf.mxu1 }
  0xe8   : > { %534 = vst [vmem:[%s1980_s24 + $0xd8] sm:$0xff] %v492_v39 }
  0xe9   : > { %511 = vst [vmem:[%s1980_s24 + $0x20] sm:$0xff] %v435_v40 }
  0xea   : > { %519 = vst [vmem:[%s1980_s24 + $0x60] sm:$0xff] %v455_v41 }
  0xee   : > { %v475_v42 = vpop.f32.mrf.mxu2  ;;  %v495_v43 = vpop.f32.mrf.mxu3 }
  0xef   : > { %527 = vst [vmem:[%s1980_s24 + $0xa0] sm:$0xff] %v475_v42  ;;  %v437_v44 = vpop.f32.mrf.mxu0  ;;  %v457_v45 = vpop.f32.mrf.mxu1 }
  0xf0   : > { %535 = vst [vmem:[%s1980_s24 + $0xe0] sm:$0xff] %v495_v43 }
  0xf1   : > { %512 = vst [vmem:[%s1980_s24 + $0x28] sm:$0xff] %v437_v44 }
  0xf2   : > { %520 = vst [vmem:[%s1980_s24 + $0x68] sm:$0xff] %v457_v45 }
  0xf6   : > { %v477_v46 = vpop.f32.mrf.mxu2  ;;  %v497_v47 = vpop.f32.mrf.mxu3 }
  0xf7   : > { %528 = vst [vmem:[%s1980_s24 + $0xa8] sm:$0xff] %v477_v46  ;;  %v440_v48 = vpop.f32.mrf.mxu0  ;;  %v460_v49 = vpop.f32.mrf.mxu1 }
  0xf8   : > { %536 = vst [vmem:[%s1980_s24 + $0xe8] sm:$0xff] %v497_v47 }
  0xf9   : > { %513 = vst [vmem:[%s1980_s24 + $0x30] sm:$0xff] %v440_v48 }
  0xfa   : > { %521 = vst [vmem:[%s1980_s24 + $0x70] sm:$0xff] %v460_v49 }
  0xfe   : > { %v480_v50 = vpop.f32.mrf.mxu2  ;;  %v500_v51 = vpop.f32.mrf.mxu3 }
  0xff   : > { %529 = vst [vmem:[%s1980_s24 + $0xb0] sm:$0xff] %v480_v50  ;;  %v442_v52 = vpop.f32.mrf.mxu0  ;;  %v462_v53 = vpop.f32.mrf.mxu1 }
 0x100   : > { %537 = vst [vmem:[%s1980_s24 + $0xf0] sm:$0xff] %v500_v51 }
 0x101   : > { %514 = vst [vmem:[%s1980_s24 + $0x38] sm:$0xff] %v442_v52 }
 0x102   : > { %522 = vst [vmem:[%s1980_s24 + $0x78] sm:$0xff] %v462_v53 }
 0x104   : > { %542 = sbr.rel (%p1590_p1) target bundleno = 652 (0x28c), region = 48 }
 0x106   : > { %v482_v54 = vpop.f32.mrf.mxu2  ;;  %v502_v55 = vpop.f32.mrf.mxu3 }
 0x107   : > { %530 = vst [vmem:[%s1980_s24 + $0xb8] sm:$0xff] %v482_v54 }
 0x108   : > { %538 = vst [vmem:[%s1980_s24 + $0xf8] sm:$0xff] %v502_v55 }
 0x10f   : > { %v2015_v56 = vld [vmem:[#allocation7] sm:$0xff]  ;;  %v2017_v57 = vld [vmem:[#allocation7 + $0x8] sm:$0xff]  ;;  %v2019_v58 = vld [vmem:[#allocation7 + $0x10] sm:$0xff] }
 0x110   : > { %2607 = vst [vmem:[#allocation11_spill] sm:$0xff] %v2015_v56  ;;  %v800_v59 = vadd.f32 %v2017_v57, %v2015_v56  ;;  %v2023_v60 = vld [vmem:[#allocation7 + $0x18] sm:$0xff]  ;;  %v2026_v62 = vld [vmem:[#allocation7 + $0x20] sm:$0xff]  ;;  %v2029_v0 = vld [vmem:[#allocation7 + $0x28] sm:$0xff] }
 0x111   : > { %2608 = vst [vmem:[#allocation12_spill] sm:$0xff] %v2017_v57  ;;  %v2032_v2 = vld [vmem:[#allocation7 + $0x30] sm:$0xff]  ;;  %v2035_v4 = vld [vmem:[#allocation7 + $0x38] sm:$0xff]  ;;  %v2038_v6 = vld [vmem:[#allocation7 + $0x40] sm:$0xff] }
 0x112   : > { %2609 = vst [vmem:[#allocation13_spill] sm:$0xff] %v2019_v58  ;;  %v801_v61 = vadd.f32 %v800_v59, %v2019_v58  ;;  %v2041_v8 = vld [vmem:[#allocation7 + $0x48] sm:$0xff]  ;;  %v2044_v10 = vld [vmem:[#allocation7 + $0x50] sm:$0xff]  ;;  %v2047_v12 = vld [vmem:[#allocation7 + $0x58] sm:$0xff] }
 0x113   : > { %2610 = vst [vmem:[#allocation14_spill] sm:$0xff] %v2023_v60  ;;  %v2050_v14 = vld [vmem:[#allocation7 + $0x60] sm:$0xff]  ;;  %v2053_v16 = vld [vmem:[#allocation7 + $0x68] sm:$0xff]  ;;  %v2056_v18 = vld [vmem:[#allocation7 + $0x70] sm:$0xff] }
 0x114   : > { %2611 = vst [vmem:[#allocation15_spill] sm:$0xff] %v2026_v62  ;;  %v802_v63 = vadd.f32 %v801_v61, %v2023_v60  ;;  %v2059_v20 = vld [vmem:[#allocation7 + $0x78] sm:$0xff]  ;;  %v2062_v22 = vld [vmem:[#allocation7 + $0x80] sm:$0xff]  ;;  %v2065_v24 = vld [vmem:[#allocation7 + $0x88] sm:$0xff] }
 0x115   : > { %2612 = vst [vmem:[#allocation16_spill] sm:$0xff] %v2029_v0  ;;  %v2068_v26 = vld [vmem:[#allocation7 + $0x90] sm:$0xff]  ;;  %v2071_v28 = vld [vmem:[#allocation7 + $0x98] sm:$0xff]  ;;  %v2074_v30 = vld [vmem:[#allocation7 + $0xa0] sm:$0xff] }
 0x116   : > { %v803_v1 = vadd.f32 %v802_v63, %v2026_v62  ;;  %v2077_v32 = vld [vmem:[#allocation7 + $0xa8] sm:$0xff]  ;;  %v2080_v34 = vld [vmem:[#allocation7 + $0xb0] sm:$0xff]  ;;  %v2083_v36 = vld [vmem:[#allocation7 + $0xb8] sm:$0xff] }
 0x117   : > { %v2086_v38 = vld [vmem:[#allocation7 + $0xc0] sm:$0xff]  ;;  %v2089_v40 = vld [vmem:[#allocation7 + $0xc8] sm:$0xff]  ;;  %v2092_v42 = vld [vmem:[#allocation7 + $0xd0] sm:$0xff] }
 0x118   : > { %v804_v3 = vadd.f32 %v803_v1, %v2029_v0  ;;  %v2095_v44 = vld [vmem:[#allocation7 + $0xd8] sm:$0xff]  ;;  %v2098_v46 = vld [vmem:[#allocation7 + $0xe0] sm:$0xff]  ;;  %v2101_v48 = vld [vmem:[#allocation7 + $0xe8] sm:$0xff] }
 0x119   : > { %v2104_v50 = vld [vmem:[#allocation7 + $0xf0] sm:$0xff]  ;;  %v2107_v52 = vld [vmem:[#allocation7 + $0xf8] sm:$0xff]  ;;  %v2110_v54 = vld [vmem:[#allocation7 + $0x100] sm:$0xff] }
 0x11a   : > { %v805_v5 = vadd.f32 %v804_v3, %v2032_v2  ;;  %v2113_v59 = vld [vmem:[#allocation7 + $0x108] sm:$0xff]  ;;  %v2116_v63 = vld [vmem:[#allocation7 + $0x110] sm:$0xff]  ;;  %v2119_v3 = vld [vmem:[#allocation7 + $0x118] sm:$0xff] }
 0x11c   : > { %v806_v7 = vadd.f32 %v805_v5, %v2035_v4 }
 0x11e   : > { %v807_v9 = vadd.f32 %v806_v7, %v2038_v6  ;;  %v2122_v7 = vld [vmem:[#allocation7 + $0x120] sm:$0xff] }
 0x120   : > { %v808_v11 = vadd.f32 %v807_v9, %v2041_v8 }
 0x122   : > { %v809_v13 = vadd.f32 %v808_v11, %v2044_v10  ;;  %v2125_v11 = vld [vmem:[#allocation7 + $0x128] sm:$0xff] }
 0x124   : > { %v810_v15 = vadd.f32 %v809_v13, %v2047_v12 }
 0x126   : > { %v811_v17 = vadd.f32 %v810_v15, %v2050_v14  ;;  %v2128_v15 = vld [vmem:[#allocation7 + $0x130] sm:$0xff] }
 0x128   : > { %v812_v19 = vadd.f32 %v811_v17, %v2053_v16 }
 0x12a   : > { %v813_v21 = vadd.f32 %v812_v19, %v2056_v18  ;;  %v2131_v19 = vld [vmem:[#allocation7 + $0x138] sm:$0xff] }
 0x12c   : > { %v814_v23 = vadd.f32 %v813_v21, %v2059_v20 }
 0x12e   : > { %v815_v25 = vadd.f32 %v814_v23, %v2062_v22  ;;  %v2134_v23 = vld [vmem:[#allocation7 + $0x140] sm:$0xff] }
 0x130   : > { %v816_v27 = vadd.f32 %v815_v25, %v2065_v24 }
 0x132   : > { %v817_v29 = vadd.f32 %v816_v27, %v2068_v26  ;;  %v2137_v27 = vld [vmem:[#allocation7 + $0x148] sm:$0xff] }
 0x134   : > { %v818_v31 = vadd.f32 %v817_v29, %v2071_v28 }
 0x136   : > { %v819_v33 = vadd.f32 %v818_v31, %v2074_v30  ;;  %v2140_v31 = vld [vmem:[#allocation7 + $0x150] sm:$0xff] }
 0x138   : > { %v820_v35 = vadd.f32 %v819_v33, %v2077_v32 }
 0x13a   : > { %v821_v37 = vadd.f32 %v820_v35, %v2080_v34  ;;  %v2143_v35 = vld [vmem:[#allocation7 + $0x158] sm:$0xff] }
 0x13c   : > { %v822_v39 = vadd.f32 %v821_v37, %v2083_v36 }
 0x13e   : > { %v823_v41 = vadd.f32 %v822_v39, %v2086_v38  ;;  %v2146_v39 = vld [vmem:[#allocation7 + $0x160] sm:$0xff] }
 0x13f   : > { %2613 = vst [vmem:[#allocation17_spill] sm:$0xff] %v2146_v39 }
 0x140   : > { %v824_v43 = vadd.f32 %v823_v41, %v2089_v40 }
 0x142   : > { %v825_v45 = vadd.f32 %v824_v43, %v2092_v42  ;;  %v2149_v43 = vld [vmem:[#allocation7 + $0x168] sm:$0xff] }
 0x143   : > { %2614 = vst [vmem:[#allocation18_spill] sm:$0xff] %v2149_v43 }
 0x144   : > { %v826_v47 = vadd.f32 %v825_v45, %v2095_v44 }
 0x146   : > { %v827_v49 = vadd.f32 %v826_v47, %v2098_v46  ;;  %v2152_v47 = vld [vmem:[#allocation7 + $0x170] sm:$0xff] }
 0x147   : > { %2615 = vst [vmem:[#allocation19_spill] sm:$0xff] %v2152_v47 }
 0x148   : > { %v828_v51 = vadd.f32 %v827_v49, %v2101_v48 }
 0x14a   : > { %v829_v53 = vadd.f32 %v828_v51, %v2104_v50  ;;  %v2155_v51 = vld [vmem:[#allocation7 + $0x178] sm:$0xff] }
 0x14b   : > { %2616 = vst [vmem:[#allocation20_spill] sm:$0xff] %v2155_v51 }
 0x14c   : > { %v830_v55 = vadd.f32 %v829_v53, %v2107_v52 }
 0x14e   : > { %v831_v61 = vadd.f32 %v830_v55, %v2110_v54  ;;  %v2158_v55 = vld [vmem:[#allocation7 + $0x180] sm:$0xff] }
 0x14f   : > { %2617 = vst [vmem:[#allocation21_spill] sm:$0xff] %v2158_v55 }
 0x150   : > { %v832_v1 = vadd.f32 %v831_v61, %v2113_v59 }
 0x152   : > { %v833_v5 = vadd.f32 %v832_v1, %v2116_v63  ;;  %v2161_v1 = vld [vmem:[#allocation7 + $0x188] sm:$0xff] }
 0x153   : > { %2618 = vst [vmem:[#allocation22_spill] sm:$0xff] %v2161_v1 }
 0x154   : > { %v834_v9 = vadd.f32 %v833_v5, %v2119_v3 }
 0x156   : > { %v835_v13 = vadd.f32 %v834_v9, %v2122_v7  ;;  %v2164_v9 = vld [vmem:[#allocation7 + $0x190] sm:$0xff] }
 0x157   : > { %2619 = vst [vmem:[#allocation23_spill] sm:$0xff] %v2164_v9 }
 0x158   : > { %v836_v17 = vadd.f32 %v835_v13, %v2125_v11 }
 0x15a   : > { %v837_v21 = vadd.f32 %v836_v17, %v2128_v15  ;;  %v2167_v17 = vld [vmem:[#allocation7 + $0x198] sm:$0xff] }
 0x15b   : > { %2620 = vst [vmem:[#allocation24_spill] sm:$0xff] %v2167_v17 }
 0x15c   : > { %v838_v25 = vadd.f32 %v837_v21, %v2131_v19 }
 0x15e   : > { %v839_v29 = vadd.f32 %v838_v25, %v2134_v23  ;;  %v2170_v25 = vld [vmem:[#allocation7 + $0x1a0] sm:$0xff] }
 0x15f   : > { %2621 = vst [vmem:[#allocation25_spill] sm:$0xff] %v2170_v25 }
 0x160   : > { %v840_v33 = vadd.f32 %v839_v29, %v2137_v27 }
 0x162   : > { %v841_v37 = vadd.f32 %v840_v33, %v2140_v31  ;;  %v2173_v33 = vld [vmem:[#allocation7 + $0x1a8] sm:$0xff] }
 0x163   : > { %2622 = vst [vmem:[#allocation26_spill] sm:$0xff] %v2173_v33 }
 0x164   : > { %v842_v41 = vadd.f32 %v841_v37, %v2143_v35 }
 0x166   : > { %v843_v45 = vadd.f32 %v842_v41, %v2146_v39  ;;  %v2176_v41 = vld [vmem:[#allocation7 + $0x1b0] sm:$0xff] }
 0x167   : > { %2623 = vst [vmem:[#allocation27_spill] sm:$0xff] %v2176_v41 }
 0x168   : > { %v844_v49 = vadd.f32 %v843_v45, %v2149_v43 }
 0x16a   : > { %v845_v53 = vadd.f32 %v844_v49, %v2152_v47  ;;  %v2179_v49 = vld [vmem:[#allocation7 + $0x1b8] sm:$0xff] }
 0x16b   : > { %2624 = vst [vmem:[#allocation28_spill] sm:$0xff] %v2179_v49 }
 0x16c   : > { %v846_v61 = vadd.f32 %v845_v53, %v2155_v51 }
 0x16e   : > { %v847_v5 = vadd.f32 %v846_v61, %v2158_v55  ;;  %v2182_v61 = vld [vmem:[#allocation7 + $0x1c0] sm:$0xff] }
 0x16f   : > { %2625 = vst [vmem:[#allocation29_spill] sm:$0xff] %v2182_v61 }
 0x170   : > { %v848_v13 = vadd.f32 %v847_v5, %v2161_v1 }
 0x172   : > { %v849_v21 = vadd.f32 %v848_v13, %v2164_v9  ;;  %v2185_v13 = vld [vmem:[#allocation7 + $0x1c8] sm:$0xff]  ;;  %v2195_v9 = vld [vmem:[#allocation7 + $0x1e0] sm:$0xff] }
 0x173   : > { %2626 = vst [vmem:[#allocation30_spill] sm:$0xff] %v2185_v13 }
 0x174   : > { %v850_v29 = vadd.f32 %v849_v21, %v2167_v17  ;;  %v2188_v17 = vld [vmem:[#allocation7 + $0x1d0] sm:$0xff]  ;;  %2629 = vst [vmem:[#allocation33_spill] sm:$0xff] %v2195_v9 }
 0x175   : > { %2627 = vst [vmem:[#allocation31_spill] sm:$0xff] %v2188_v17 }
 0x176   : > { %v851_v37 = vadd.f32 %v850_v29, %v2170_v25  ;;  %v2191_v25 = vld [vmem:[#allocation7 + $0x1d8] sm:$0xff] }
 0x177   : > { %2628 = vst [vmem:[#allocation32_spill] sm:$0xff] %v2191_v25 }
 0x178   : > { %v852_v45 = vadd.f32 %v851_v37, %v2173_v33 }
 0x17a   : > { %v853_v53 = vadd.f32 %v852_v45, %v2176_v41  ;;  %v2198_v41 = vld [vmem:[#allocation7 + $0x1e8] sm:$0xff] }
 0x17b   : > { %2630 = vst [vmem:[#allocation34_spill] sm:$0xff] %v2198_v41 }
 0x17c   : > { %v854_v5 = vadd.f32 %v853_v53, %v2179_v49  ;;  %v2201_v49 = vld [vmem:[#allocation7 + $0x1f0] sm:$0xff] }
 0x17d   : > { %2631 = vst [vmem:[#allocation35_spill] sm:$0xff] %v2201_v49 }
 0x17e   : > { %v855_v21 = vadd.f32 %v854_v5, %v2182_v61  ;;  %v2204_v61 = vld [vmem:[#allocation7 + $0x1f8] sm:$0xff] }
 0x17f   : > { %2632 = vst [vmem:[#allocation36_spill] sm:$0xff] %v2204_v61 }
 0x180   : > { %v856_v29 = vadd.f32 %v855_v21, %v2185_v13 }
 0x182   : > { %v857_v37 = vadd.f32 %v856_v29, %v2188_v17 }
 0x184   : > { %v858_v33 = vadd.f32 %v857_v37, %v2191_v25 }
 0x186   : > { %v859_v45 = vadd.f32 %v858_v33, %v2195_v9 }
 0x188   : > { %v860_v53 = vadd.f32 %v859_v45, %v2198_v41 }
 0x18a   : > { %v861_v5 = vadd.f32 %v860_v53, %v2201_v49 }
 0x18c   : > { %v862_v21 = vadd.f32 %v861_v5, %v2204_v61 }
 0x18e   : > { %v863_v13 = vrot.slane %v862_v21, 4 }
 0x190   : > { %v864_v29 = vadd.f32 %v863_v13, %v862_v21 }
 0x192   : > { %v865_v17 = vrot.slane %v864_v29, 2 }
 0x194   : > { %v866_v37 = vadd.f32 %v865_v17, %v864_v29 }
 0x196   : > { %v867_v25 = vrot.slane %v866_v37, 1 }
 0x198   : > { %v868_v1 = vadd.f32 %v867_v25, %v866_v37 }
 0x19a   : > { %v2207_v55 = vmul.f32 0.001953125, %v868_v1 }
 0x19c   : > { %v870_v33 = vsub.f32 %v2015_v56, %v2207_v55  ;;  %v871_v45 = vsub.f32 %v2017_v57, %v2207_v55  ;;  %v872_v53 = vsub.f32 %v2019_v58, %v2207_v55  ;;  %v873_v5 = vsub.f32 %v2023_v60, %v2207_v55 }
 0x19d   : > { %v874_v17 = vsub.f32 %v2026_v62, %v2207_v55  ;;  %v875_v1 = vsub.f32 %v2029_v0, %v2207_v55  ;;  %v876_v37 = vsub.f32 %v2032_v2, %v2207_v55  ;;  %v877_v58 = vsub.f32 %v2035_v4, %v2207_v55 }
 0x19e   : > { %v998_v61 = vmul.f32 %v870_v33, %v870_v33  ;;  %v999_v13 = vmul.f32 %v871_v45, %v871_v45  ;;  %v1000_v25 = vmul.f32 %v872_v53, %v872_v53  ;;  %v1001_v21 = vmul.f32 %v873_v5, %v873_v5 }
 0x19f   : > { %v1002_v57 = vmul.f32 %v874_v17, %v874_v17  ;;  %v1003_v60 = vmul.f32 %v875_v1, %v875_v1  ;;  %v878_v45 = vsub.f32 %v2038_v6, %v2207_v55  ;;  %v1004_v62 = vmul.f32 %v876_v37, %v876_v37 }
 0x1a0   : > { %v1062_v29 = vadd.f32 %v999_v13, %v998_v61  ;;  %v879_v0 = vsub.f32 %v2041_v8, %v2207_v55  ;;  %v1005_v5 = vmul.f32 %v877_v58, %v877_v58  ;;  %v880_v13 = vsub.f32 %v2044_v10, %v2207_v55 }
 0x1a1   : > { %v1006_v17 = vmul.f32 %v878_v45, %v878_v45 }
 0x1a2   : > { %v1063_v56 = vadd.f32 %v1062_v29, %v1000_v25  ;;  %v881_v29 = vsub.f32 %v2047_v12, %v2207_v55  ;;  %v1007_v1 = vmul.f32 %v879_v0, %v879_v0  ;;  %v1008_v37 = vmul.f32 %v880_v13, %v880_v13 }
 0x1a4   : > { %v1064_v33 = vadd.f32 %v1063_v56, %v1001_v21  ;;  %v882_v21 = vsub.f32 %v2050_v14, %v2207_v55  ;;  %v1009_v58 = vmul.f32 %v881_v29, %v881_v29 }
 0x1a6   : > { %v1065_v53 = vadd.f32 %v1064_v33, %v1002_v57  ;;  %v883_v33 = vsub.f32 %v2053_v16, %v2207_v55  ;;  %v1010_v45 = vmul.f32 %v882_v21, %v882_v21 }
 0x1a8   : > { %v1066_v61 = vadd.f32 %v1065_v53, %v1003_v60  ;;  %v884_v53 = vsub.f32 %v2056_v18, %v2207_v55  ;;  %v1011_v0 = vmul.f32 %v883_v33, %v883_v33 }
 0x1aa   : > { %v1067_v25 = vadd.f32 %v1066_v61, %v1004_v62  ;;  %v885_v61 = vsub.f32 %v2059_v20, %v2207_v55  ;;  %v1012_v13 = vmul.f32 %v884_v53, %v884_v53 }
 0x1ac   : > { %v1068_v56 = vadd.f32 %v1067_v25, %v1005_v5  ;;  %v886_v25 = vsub.f32 %v2062_v22, %v2207_v55  ;;  %v1013_v29 = vmul.f32 %v885_v61, %v885_v61 }
 0x1ae   : > { %v1069_v57 = vadd.f32 %v1068_v56, %v1006_v17  ;;  %v887_v56 = vsub.f32 %v2065_v24, %v2207_v55  ;;  %v1014_v21 = vmul.f32 %v886_v25, %v886_v25 }
 0x1b0   : > { %v1070_v60 = vadd.f32 %v1069_v57, %v1007_v1  ;;  %v888_v57 = vsub.f32 %v2068_v26, %v2207_v55  ;;  %v1015_v33 = vmul.f32 %v887_v56, %v887_v56 }
 0x1b2   : > { %v1071_v62 = vadd.f32 %v1070_v60, %v1008_v37  ;;  %v889_v60 = vsub.f32 %v2071_v28, %v2207_v55  ;;  %v1016_v53 = vmul.f32 %v888_v57, %v888_v57 }
 0x1b4   : > { %v1072_v5 = vadd.f32 %v1071_v62, %v1009_v58  ;;  %v890_v62 = vsub.f32 %v2074_v30, %v2207_v55  ;;  %v1017_v61 = vmul.f32 %v889_v60, %v889_v60 }
 0x1b6   : > { %v1073_v17 = vadd.f32 %v1072_v5, %v1010_v45  ;;  %v891_v5 = vsub.f32 %v2077_v32, %v2207_v55  ;;  %v1018_v25 = vmul.f32 %v890_v62, %v890_v62 }
 0x1b8   : > { %v1074_v1 = vadd.f32 %v1073_v17, %v1011_v0  ;;  %v892_v17 = vsub.f32 %v2080_v34, %v2207_v55  ;;  %v1019_v56 = vmul.f32 %v891_v5, %v891_v5 }
 0x1ba   : > { %v1075_v37 = vadd.f32 %v1074_v1, %v1012_v13  ;;  %v893_v1 = vsub.f32 %v2083_v36, %v2207_v55  ;;  %v1020_v57 = vmul.f32 %v892_v17, %v892_v17 }
 0x1bc   : > { %v1076_v58 = vadd.f32 %v1075_v37, %v1013_v29  ;;  %v894_v37 = vsub.f32 %v2086_v38, %v2207_v55  ;;  %v1021_v60 = vmul.f32 %v893_v1, %v893_v1 }
 0x1be   : > { %v1077_v45 = vadd.f32 %v1076_v58, %v1014_v21  ;;  %v895_v58 = vsub.f32 %v2089_v40, %v2207_v55  ;;  %v1022_v62 = vmul.f32 %v894_v37, %v894_v37 }
 0x1c0   : > { %v1078_v0 = vadd.f32 %v1077_v45, %v1015_v33  ;;  %v896_v45 = vsub.f32 %v2092_v42, %v2207_v55  ;;  %v1023_v5 = vmul.f32 %v895_v58, %v895_v58 }
 0x1c2   : > { %v1079_v13 = vadd.f32 %v1078_v0, %v1016_v53  ;;  %v897_v0 = vsub.f32 %v2095_v44, %v2207_v55  ;;  %v1024_v17 = vmul.f32 %v896_v45, %v896_v45 }
 0x1c4   : > { %v1080_v29 = vadd.f32 %v1079_v13, %v1017_v61  ;;  %v898_v13 = vsub.f32 %v2098_v46, %v2207_v55  ;;  %v1025_v1 = vmul.f32 %v897_v0, %v897_v0 }
 0x1c6   : > { %v1081_v21 = vadd.f32 %v1080_v29, %v1018_v25  ;;  %v899_v29 = vsub.f32 %v2101_v48, %v2207_v55  ;;  %v1026_v37 = vmul.f32 %v898_v13, %v898_v13 }
 0x1c8   : > { %v1082_v33 = vadd.f32 %v1081_v21, %v1019_v56  ;;  %v900_v21 = vsub.f32 %v2104_v50, %v2207_v55  ;;  %v1027_v58 = vmul.f32 %v899_v29, %v899_v29 }
 0x1ca   : > { %v1083_v53 = vadd.f32 %v1082_v33, %v1020_v57  ;;  %v901_v33 = vsub.f32 %v2107_v52, %v2207_v55  ;;  %v1028_v45 = vmul.f32 %v900_v21, %v900_v21 }
 0x1cc   : > { %v1084_v61 = vadd.f32 %v1083_v53, %v1021_v60  ;;  %v902_v53 = vsub.f32 %v2110_v54, %v2207_v55  ;;  %v1029_v0 = vmul.f32 %v901_v33, %v901_v33 }
 0x1ce   : > { %v1085_v25 = vadd.f32 %v1084_v61, %v1022_v62  ;;  %v903_v61 = vsub.f32 %v2113_v59, %v2207_v55  ;;  %v1030_v13 = vmul.f32 %v902_v53, %v902_v53 }
 0x1d0   : > { %v1086_v56 = vadd.f32 %v1085_v25, %v1023_v5  ;;  %v904_v25 = vsub.f32 %v2116_v63, %v2207_v55  ;;  %v1031_v29 = vmul.f32 %v903_v61, %v903_v61 }
 0x1d2   : > { %v1087_v57 = vadd.f32 %v1086_v56, %v1024_v17  ;;  %v905_v56 = vsub.f32 %v2119_v3, %v2207_v55  ;;  %v1032_v21 = vmul.f32 %v904_v25, %v904_v25 }
 0x1d4   : > { %v1088_v60 = vadd.f32 %v1087_v57, %v1025_v1  ;;  %v906_v57 = vsub.f32 %v2122_v7, %v2207_v55  ;;  %v1033_v33 = vmul.f32 %v905_v56, %v905_v56 }
 0x1d6   : > { %v1089_v62 = vadd.f32 %v1088_v60, %v1026_v37  ;;  %v907_v60 = vsub.f32 %v2125_v11, %v2207_v55  ;;  %v1034_v53 = vmul.f32 %v906_v57, %v906_v57 }
 0x1d8   : > { %v1090_v5 = vadd.f32 %v1089_v62, %v1027_v58  ;;  %v908_v62 = vsub.f32 %v2128_v15, %v2207_v55  ;;  %v1035_v61 = vmul.f32 %v907_v60, %v907_v60 }
 0x1da   : > { %v1091_v17 = vadd.f32 %v1090_v5, %v1028_v45  ;;  %v909_v5 = vsub.f32 %v2131_v19, %v2207_v55  ;;  %v1036_v25 = vmul.f32 %v908_v62, %v908_v62 }
 0x1dc   : > { %v1092_v1 = vadd.f32 %v1091_v17, %v1029_v0  ;;  %v910_v17 = vsub.f32 %v2134_v23, %v2207_v55  ;;  %v1037_v56 = vmul.f32 %v909_v5, %v909_v5 }
 0x1de   : > { %v1093_v37 = vadd.f32 %v1092_v1, %v1030_v13  ;;  %v911_v1 = vsub.f32 %v2137_v27, %v2207_v55  ;;  %v1038_v57 = vmul.f32 %v910_v17, %v910_v17 }
 0x1e0   : > { %v1094_v58 = vadd.f32 %v1093_v37, %v1031_v29  ;;  %v912_v37 = vsub.f32 %v2140_v31, %v2207_v55  ;;  %v1039_v60 = vmul.f32 %v911_v1, %v911_v1 }
 0x1e2   : > { %v1095_v45 = vadd.f32 %v1094_v58, %v1032_v21  ;;  %v913_v58 = vsub.f32 %v2143_v35, %v2207_v55  ;;  %v1040_v62 = vmul.f32 %v912_v37, %v912_v37 }
 0x1e4   : > { %v1096_v0 = vadd.f32 %v1095_v45, %v1033_v33  ;;  %v914_v45 = vsub.f32 %v2146_v39, %v2207_v55  ;;  %v1041_v5 = vmul.f32 %v913_v58, %v913_v58 }
 0x1e6   : > { %v1097_v13 = vadd.f32 %v1096_v0, %v1034_v53  ;;  %v915_v0 = vsub.f32 %v2149_v43, %v2207_v55  ;;  %v1042_v17 = vmul.f32 %v914_v45, %v914_v45 }
 0x1e8   : > { %v1098_v29 = vadd.f32 %v1097_v13, %v1035_v61  ;;  %v916_v13 = vsub.f32 %v2152_v47, %v2207_v55  ;;  %v1043_v1 = vmul.f32 %v915_v0, %v915_v0 }
 0x1ea   : > { %v1099_v21 = vadd.f32 %v1098_v29, %v1036_v25  ;;  %v917_v29 = vsub.f32 %v2155_v51, %v2207_v55  ;;  %v1044_v37 = vmul.f32 %v916_v13, %v916_v13 }
 0x1ec   : > { %v1100_v33 = vadd.f32 %v1099_v21, %v1037_v56  ;;  %v2633_v21 = vld [vmem:[#allocation21_spill] sm:$0xff]  ;;  %v1045_v58 = vmul.f32 %v917_v29, %v917_v29 }
 0x1ed   : > { %v918_v39 = vsub.f32 %v2633_v21, %v2207_v55 }
 0x1ee   : > { %v1101_v53 = vadd.f32 %v1100_v33, %v1038_v57  ;;  %v2634_v33 = vld [vmem:[#allocation22_spill] sm:$0xff] }
 0x1ef   : > { %v919_v43 = vsub.f32 %v2634_v33, %v2207_v55  ;;  %v1046_v45 = vmul.f32 %v918_v39, %v918_v39 }
 0x1f0   : > { %v1102_v61 = vadd.f32 %v1101_v53, %v1039_v60  ;;  %v2635_v53 = vld [vmem:[#allocation23_spill] sm:$0xff] }
 0x1f1   : > { %v920_v47 = vsub.f32 %v2635_v53, %v2207_v55  ;;  %v1047_v0 = vmul.f32 %v919_v43, %v919_v43 }
 0x1f2   : > { %v1103_v25 = vadd.f32 %v1102_v61, %v1040_v62  ;;  %v2636_v61 = vld [vmem:[#allocation24_spill] sm:$0xff] }
 0x1f3   : > { %v921_v51 = vsub.f32 %v2636_v61, %v2207_v55  ;;  %v1048_v13 = vmul.f32 %v920_v47, %v920_v47 }
 0x1f4   : > { %v1104_v56 = vadd.f32 %v1103_v25, %v1041_v5  ;;  %v2637_v25 = vld [vmem:[#allocation25_spill] sm:$0xff] }
 0x1f5   : > { %v922_v21 = vsub.f32 %v2637_v25, %v2207_v55  ;;  %v1049_v29 = vmul.f32 %v921_v51, %v921_v51 }
 0x1f6   : > { %v1105_v57 = vadd.f32 %v1104_v56, %v1042_v17  ;;  %v2638_v56 = vld [vmem:[#allocation26_spill] sm:$0xff] }
 0x1f7   : > { %v923_v33 = vsub.f32 %v2638_v56, %v2207_v55  ;;  %v1050_v39 = vmul.f32 %v922_v21, %v922_v21 }
 0x1f8   : > { %v1106_v60 = vadd.f32 %v1105_v57, %v1043_v1  ;;  %v2639_v57 = vld [vmem:[#allocation27_spill] sm:$0xff] }
 0x1f9   : > { %v924_v53 = vsub.f32 %v2639_v57, %v2207_v55  ;;  %v1051_v43 = vmul.f32 %v923_v33, %v923_v33 }
 0x1fa   : > { %v1107_v62 = vadd.f32 %v1106_v60, %v1044_v37  ;;  %v2640_v60 = vld [vmem:[#allocation28_spill] sm:$0xff] }
 0x1fb   : > { %v925_v61 = vsub.f32 %v2640_v60, %v2207_v55  ;;  %v1052_v47 = vmul.f32 %v924_v53, %v924_v53 }
 0x1fc   : > { %v1108_v5 = vadd.f32 %v1107_v62, %v1045_v58  ;;  %v2641_v62 = vld [vmem:[#allocation29_spill] sm:$0xff] }
 0x1fd   : > { %v926_v25 = vsub.f32 %v2641_v62, %v2207_v55  ;;  %v1053_v51 = vmul.f32 %v925_v61, %v925_v61 }
 0x1fe   : > { %v1109_v17 = vadd.f32 %v1108_v5, %v1046_v45  ;;  %v2642_v5 = vld [vmem:[#allocation30_spill] sm:$0xff] }
 0x1ff   : > { %v927_v56 = vsub.f32 %v2642_v5, %v2207_v55  ;;  %v1054_v21 = vmul.f32 %v926_v25, %v926_v25 }
 0x200   : > { %v1110_v1 = vadd.f32 %v1109_v17, %v1047_v0  ;;  %v2643_v17 = vld [vmem:[#allocation31_spill] sm:$0xff] }
 0x201   : > { %v928_v57 = vsub.f32 %v2643_v17, %v2207_v55  ;;  %v1055_v33 = vmul.f32 %v927_v56, %v927_v56 }
 0x202   : > { %v1111_v37 = vadd.f32 %v1110_v1, %v1048_v13  ;;  %v2644_v1 = vld [vmem:[#allocation32_spill] sm:$0xff] }
 0x203   : > { %v929_v60 = vsub.f32 %v2644_v1, %v2207_v55  ;;  %v1056_v53 = vmul.f32 %v928_v57, %v928_v57 }
 0x204   : > { %v1112_v58 = vadd.f32 %v1111_v37, %v1049_v29  ;;  %v930_v37 = vsub.f32 %v2195_v9, %v2207_v55 }
 0x205   : > { %v1057_v61 = vmul.f32 %v929_v60, %v929_v60 }
 0x206   : > { %v1113_v45 = vadd.f32 %v1112_v58, %v1050_v39  ;;  %v931_v58 = vsub.f32 %v2198_v41, %v2207_v55  ;;  %v1058_v25 = vmul.f32 %v930_v37, %v930_v37 }
 0x208   : > { %v1114_v0 = vadd.f32 %v1113_v45, %v1051_v43  ;;  %v932_v45 = vsub.f32 %v2201_v49, %v2207_v55  ;;  %v1059_v56 = vmul.f32 %v931_v58, %v931_v58 }
 0x20a   : > { %v1115_v13 = vadd.f32 %v1114_v0, %v1052_v47  ;;  %v2645_v0 = vld [vmem:[#allocation36_spill] sm:$0xff] }
 0x20b   : > { %v933_v1 = vsub.f32 %v2645_v0, %v2207_v55 }
 0x20c   : > { %v1116_v29 = vadd.f32 %v1115_v13, %v1053_v51  ;;  %v1060_v13 = vmul.f32 %v932_v45, %v932_v45 }
 0x20d   : > { %v1061_v9 = vmul.f32 %v933_v1, %v933_v1 }
 0x20e   : > { %v1117_v39 = vadd.f32 %v1116_v29, %v1054_v21 }
 0x210   : > { %v1118_v43 = vadd.f32 %v1117_v39, %v1055_v33 }
 0x212   : > { %v1119_v47 = vadd.f32 %v1118_v43, %v1056_v53 }
 0x214   : > { %v1120_v51 = vadd.f32 %v1119_v47, %v1057_v61 }
 0x216   : > { %v1121_v17 = vadd.f32 %v1120_v51, %v1058_v25  ;;  %v2646_v25 = vld [vmem:[#allocation11_spill] sm:$0xff]  ;;  %v2648_v51 = vld [vmem:[#allocation13_spill] sm:$0xff] }
 0x218   : > { %v1122_v57 = vadd.f32 %v1121_v17, %v1059_v56 }
 0x21a   : > { %v1123_v21 = vadd.f32 %v1122_v57, %v1060_v13  ;;  %v2649_v57 = vld [vmem:[#allocation14_spill] sm:$0xff] }
 0x21c   : > { %v1124_v29 = vadd.f32 %v1123_v21, %v1061_v9  ;;  %v1132_v9 = vld [vmem:[%s2562_s2] sm:$0x1] }
 0x21e   : > { %v1125_v5 = vrot.slane %v1124_v29, 4 }
 0x220   : > { %v1126_v41 = vadd.f32 %v1125_v5, %v1124_v29  ;;  %v2650_v29 = vld [vmem:[#allocation15_spill] sm:$0xff] }
 0x222   : > { %v1127_v60 = vrot.slane %v1126_v41, 2 }
 0x224   : > { %v1128_v33 = vadd.f32 %v1127_v60, %v1126_v41 }
 0x226   : > { %v1129_v39 = vrot.slane %v1128_v33, 1 }
 0x228   : > { %v1130_v62 = vadd.f32 %v1129_v39, %v1128_v33  ;;  %v2651_v33 = vld [vmem:[#allocation16_spill] sm:$0xff] }
 0x22a   : > { %v1131_v49 = vmul.f32 0.001953125, %v1130_v62 }
 0x22c   : > { %v1133_v37 = vadd.f32 1e-05, %v1131_v49  ;;  %v1145_v49 = vld [vmem:[%s2563_s3] sm:$0x1] }
 0x22e   : > { %1705 = vrsqrt.f32 %v1133_v37  ;;  %vm1140_vm0 = vweird.f32 %v1133_v37 }
 0x234   : > { %v1706_v53 = vpop.eup %1705 }
 0x235   : > { %v1135_v43 = vmul.f32 %v1706_v53, %v1133_v37  ;;  %vm1141_vm1 = vweird.f32 %v1706_v53 }
 0x236   : > { %vm1142_vm2 = vmor %vm1140_vm0, %vm1141_vm1 }
 0x237   : > { %v1136_v0 = vmul.f32 %v1706_v53, %v1135_v43 }
 0x239   : > { %v1137_v58 = vmul.f32 0.5, %v1136_v0  ;;  %v2647_v0 = vld [vmem:[#allocation12_spill] sm:$0xff] }
 0x23b   : > { %v1138_v61 = vsub.f32 1.5, %v1137_v58 }
 0x23d   : > { %v1139_v5 = vmul.f32 %v1706_v53, %v1138_v61 }
 0x23f   : > { %v1143_v17 = vsel %vm1142_vm2, %v1706_v53, %v1139_v5 }
 0x240   : > { %v1144_v41 = vmul.f32 %v1143_v17, %v1132_v9 }
 0x242   : > { %v1146_v62 = vmul.f32 %v1144_v41, %v2207_v55  ;;  %v2344_v1 = vperm.slane %v1144_v41, 0 }
 0x244   : > { %v1147_v45 = vsub.f32 %v1145_v49, %v1146_v62  ;;  %v1151_v47 = vmul.f32 %v2344_v1, %v2646_v25  ;;  %v1152_v56 = vmul.f32 %v2344_v1, %v2647_v0  ;;  %v1153_v13 = vmul.f32 %v2344_v1, %v2648_v51 }
 0x245   : > { %v1154_v21 = vmul.f32 %v2344_v1, %v2649_v57  ;;  %v1155_v60 = vmul.f32 %v2344_v1, %v2650_v29  ;;  %v1156_v55 = vmul.f32 %v2344_v1, %v2651_v33  ;;  %v1157_v37 = vmul.f32 %v2344_v1, %v2032_v2 }
 0x246   : > { %v2358_v39 = vperm.slane %v1147_v45, 0  ;;  %v1158_v53 = vmul.f32 %v2344_v1, %v2035_v4  ;;  %v1159_v43 = vmul.f32 %v2344_v1, %v2038_v6  ;;  %v1160_v2 = vmul.f32 %v2344_v1, %v2041_v8 }
 0x247   : > { %v1161_v4 = vmul.f32 %v2344_v1, %v2044_v10  ;;  %v1162_v0 = vmul.f32 %v2344_v1, %v2047_v12  ;;  %v1163_v8 = vmul.f32 %v2344_v1, %v2050_v14  ;;  %v1164_v57 = vmul.f32 %v2344_v1, %v2053_v16 }
 0x248   : > { %v1218_v58 = vadd.f32 %v2358_v39, %v1151_v47  ;;  %v1219_v61 = vadd.f32 %v2358_v39, %v1152_v56  ;;  %v1220_v9 = vadd.f32 %v2358_v39, %v1153_v13  ;;  %v1221_v5 = vadd.f32 %v2358_v39, %v1154_v21 }
 0x249   : > { %v1222_v17 = vadd.f32 %v2358_v39, %v1155_v60  ;;  %v1223_v41 = vadd.f32 %v2358_v39, %v1156_v55  ;;  %v1224_v45 = vadd.f32 %v2358_v39, %v1157_v37  ;;  %v1225_v47 = vadd.f32 %v2358_v39, %v1158_v53 }
 0x24a   : > { %v1282_v49 = vmax.f32 %v1218_v58, 0.0  ;;  %v1283_v6 = vmax.f32 %v1219_v61, 0.0  ;;  %v1284_v62 = vmax.f32 %v1220_v9, 0.0  ;;  %v1285_v25 = vmax.f32 %v1221_v5, 0.0 }
 0x24b   : > { %v1286_v56 = vmax.f32 %v1222_v17, 0.0  ;;  %v1226_v51 = vadd.f32 %v2358_v39, %v1159_v43  ;;  %v1287_v10 = vmax.f32 %v1223_v41, 0.0  ;;  %v1227_v13 = vadd.f32 %v2358_v39, %v1160_v2 }
 0x24c   : > { %1346 = vst [vmem:[#allocation7] sm:$0xff] %v1282_v49  ;;  %v1288_v21 = vmax.f32 %v1224_v45, 0.0  ;;  %v1228_v29 = vadd.f32 %v2358_v39, %v1161_v4  ;;  %v1165_v12 = vmul.f32 %v2344_v1, %v2056_v18  ;;  %v1289_v60 = vmax.f32 %v1225_v47, 0.0 }
 0x24d   : > { %1347 = vst [vmem:[#allocation7 + $0x8] sm:$0xff] %v1283_v6  ;;  %v1229_v33 = vadd.f32 %v2358_v39, %v1162_v0  ;;  %v1166_v14 = vmul.f32 %v2344_v1, %v2059_v20  ;;  %v1290_v55 = vmax.f32 %v1226_v51, 0.0  ;;  %v1230_v37 = vadd.f32 %v2358_v39, %v1163_v8 }
 0x24e   : > { %1348 = vst [vmem:[#allocation7 + $0x10] sm:$0xff] %v1284_v62  ;;  %v1167_v16 = vmul.f32 %v2344_v1, %v2062_v22  ;;  %v1291_v53 = vmax.f32 %v1227_v13, 0.0  ;;  %v1231_v43 = vadd.f32 %v2358_v39, %v1164_v57  ;;  %v1168_v18 = vmul.f32 %v2344_v1, %v2065_v24 }
 0x24f   : > { %1349 = vst [vmem:[#allocation7 + $0x18] sm:$0xff] %v1285_v25  ;;  %v1292_v58 = vmax.f32 %v1228_v29, 0.0  ;;  %v1232_v61 = vadd.f32 %v2358_v39, %v1165_v12  ;;  %v1169_v20 = vmul.f32 %v2344_v1, %v2068_v26  ;;  %v1293_v9 = vmax.f32 %v1229_v33, 0.0 }
 0x250   : > { %1350 = vst [vmem:[#allocation7 + $0x20] sm:$0xff] %v1286_v56  ;;  %v1233_v5 = vadd.f32 %v2358_v39, %v1166_v14  ;;  %v1170_v22 = vmul.f32 %v2344_v1, %v2071_v28  ;;  %v1294_v17 = vmax.f32 %v1230_v37, 0.0  ;;  %v1234_v41 = vadd.f32 %v2358_v39, %v1167_v16 }
 0x251   : > { %1351 = vst [vmem:[#allocation7 + $0x28] sm:$0xff] %v1287_v10  ;;  %v1171_v24 = vmul.f32 %v2344_v1, %v2074_v30  ;;  %v1295_v2 = vmax.f32 %v1231_v43, 0.0  ;;  %v1235_v4 = vadd.f32 %v2358_v39, %v1168_v18  ;;  %v1172_v26 = vmul.f32 %v2344_v1, %v2077_v32 }
 0x252   : > { %1352 = vst [vmem:[#allocation7 + $0x30] sm:$0xff] %v1288_v21  ;;  %v1296_v49 = vmax.f32 %v1232_v61, 0.0  ;;  %v1236_v6 = vadd.f32 %v2358_v39, %v1169_v20  ;;  %v1173_v28 = vmul.f32 %v2344_v1, %v2080_v34  ;;  %v1297_v62 = vmax.f32 %v1233_v5, 0.0 }
 0x253   : > { %1353 = vst [vmem:[#allocation7 + $0x38] sm:$0xff] %v1289_v60  ;;  %v1237_v45 = vadd.f32 %v2358_v39, %v1170_v22  ;;  %v1174_v30 = vmul.f32 %v2344_v1, %v2083_v36  ;;  %v1298_v25 = vmax.f32 %v1234_v41, 0.0  ;;  %v1238_v47 = vadd.f32 %v2358_v39, %v1171_v24 }
 0x254   : > { %1354 = vst [vmem:[#allocation7 + $0x40] sm:$0xff] %v1290_v55  ;;  %v1175_v32 = vmul.f32 %v2344_v1, %v2086_v38  ;;  %v1299_v0 = vmax.f32 %v1235_v4, 0.0  ;;  %v1239_v56 = vadd.f32 %v2358_v39, %v1172_v26  ;;  %v1176_v34 = vmul.f32 %v2344_v1, %v2089_v40 }
 0x255   : > { %1355 = vst [vmem:[#allocation7 + $0x48] sm:$0xff] %v1291_v53  ;;  %v1300_v51 = vmax.f32 %v1236_v6, 0.0  ;;  %v1240_v8 = vadd.f32 %v2358_v39, %v1173_v28  ;;  %v1177_v36 = vmul.f32 %v2344_v1, %v2092_v42  ;;  %v1301_v10 = vmax.f32 %v1237_v45, 0.0 }
 0x256   : > { %1356 = vst [vmem:[#allocation7 + $0x50] sm:$0xff] %v1292_v58  ;;  %v1241_v13 = vadd.f32 %v2358_v39, %v1174_v30  ;;  %v1178_v38 = vmul.f32 %v2344_v1, %v2095_v44  ;;  %v1302_v57 = vmax.f32 %v1238_v47, 0.0  ;;  %v1242_v21 = vadd.f32 %v2358_v39, %v1175_v32 }
 0x257   : > { %1357 = vst [vmem:[#allocation7 + $0x58] sm:$0xff] %v1293_v9  ;;  %v1179_v40 = vmul.f32 %v2344_v1, %v2098_v46  ;;  %v1303_v29 = vmax.f32 %v1239_v56, 0.0  ;;  %v1243_v12 = vadd.f32 %v2358_v39, %v1176_v34  ;;  %v1180_v42 = vmul.f32 %v2344_v1, %v2101_v48 }
 0x258   : > { %1358 = vst [vmem:[#allocation7 + $0x60] sm:$0xff] %v1294_v17  ;;  %v1304_v60 = vmax.f32 %v1240_v8, 0.0  ;;  %v1244_v33 = vadd.f32 %v2358_v39, %v1177_v36  ;;  %v1181_v44 = vmul.f32 %v2344_v1, %v2104_v50  ;;  %v1305_v14 = vmax.f32 %v1241_v13, 0.0 }
 0x259   : > { %1359 = vst [vmem:[#allocation7 + $0x68] sm:$0xff] %v1295_v2  ;;  %v1245_v55 = vadd.f32 %v2358_v39, %v1178_v38  ;;  %v1182_v46 = vmul.f32 %v2344_v1, %v2107_v52  ;;  %v1306_v37 = vmax.f32 %v1242_v21, 0.0  ;;  %v1246_v16 = vadd.f32 %v2358_v39, %v1179_v40 }
 0x25a   : > { %1360 = vst [vmem:[#allocation7 + $0x70] sm:$0xff] %v1296_v49  ;;  %v1183_v48 = vmul.f32 %v2344_v1, %v2110_v54  ;;  %v1307_v53 = vmax.f32 %v1243_v12, 0.0  ;;  %v1247_v43 = vadd.f32 %v2358_v39, %v1180_v42  ;;  %v1184_v50 = vmul.f32 %v2344_v1, %v2113_v59  ;;  %v2656_v12 = vld [vmem:[#allocation21_spill] sm:$0xff] }
 0x25b   : > { %1361 = vst [vmem:[#allocation7 + $0x78] sm:$0xff] %v1297_v62  ;;  %v1308_v18 = vmax.f32 %v1244_v33, 0.0  ;;  %v1248_v58 = vadd.f32 %v2358_v39, %v1181_v44  ;;  %v1185_v52 = vmul.f32 %v2344_v1, %v2116_v63  ;;  %v1309_v61 = vmax.f32 %v1245_v55, 0.0  ;;  %v2657_v44 = vld [vmem:[#allocation22_spill] sm:$0xff]  ;;  %v2658_v55 = vld [vmem:[#allocation36_spill] sm:$0xff] }
 0x25c   : > { %1362 = vst [vmem:[#allocation7 + $0x80] sm:$0xff] %v1298_v25  ;;  %v1249_v20 = vadd.f32 %v2358_v39, %v1182_v46  ;;  %v1186_v54 = vmul.f32 %v2344_v1, %v2119_v3  ;;  %v1310_v9 = vmax.f32 %v1246_v16, 0.0  ;;  %v1250_v5 = vadd.f32 %v2358_v39, %v1183_v48  ;;  %v2659_v48 = vld [vmem:[#allocation23_spill] sm:$0xff] }
 0x25d   : > { %1363 = vst [vmem:[#allocation7 + $0x88] sm:$0xff] %v1299_v0  ;;  %v1187_v59 = vmul.f32 %v2344_v1, %v2122_v7  ;;  %v1311_v22 = vmax.f32 %v1247_v43, 0.0  ;;  %v1251_v17 = vadd.f32 %v2358_v39, %v1184_v50  ;;  %v1188_v63 = vmul.f32 %v2344_v1, %v2125_v11  ;;  %v2652_v0 = vld [vmem:[#allocation17_spill] sm:$0xff] }
 0x25e   : > { %1364 = vst [vmem:[#allocation7 + $0x90] sm:$0xff] %v1300_v51  ;;  %v1312_v41 = vmax.f32 %v1248_v58, 0.0  ;;  %v1252_v24 = vadd.f32 %v2358_v39, %v1185_v52  ;;  %v1189_v3 = vmul.f32 %v2344_v1, %v2128_v15  ;;  %v1313_v2 = vmax.f32 %v1249_v20, 0.0  ;;  %v2653_v51 = vld [vmem:[#allocation18_spill] sm:$0xff] }
 0x25f   : > { %1365 = vst [vmem:[#allocation7 + $0x98] sm:$0xff] %v1301_v10  ;;  %v1253_v4 = vadd.f32 %v2358_v39, %v1186_v54  ;;  %v1190_v7 = vmul.f32 %v2344_v1, %v2131_v19  ;;  %v1314_v26 = vmax.f32 %v1250_v5, 0.0  ;;  %v1254_v49 = vadd.f32 %v2358_v39, %v1187_v59  ;;  %v2654_v10 = vld [vmem:[#allocation19_spill] sm:$0xff]  ;;  %v2661_v54 = vld [vmem:[#allocation25_spill] sm:$0xff] }
 0x260   : > { %1366 = vst [vmem:[#allocation7 + $0xa0] sm:$0xff] %v1302_v57  ;;  %v1191_v11 = vmul.f32 %v2344_v1, %v2134_v23  ;;  %v1315_v6 = vmax.f32 %v1251_v17, 0.0  ;;  %v1255_v28 = vadd.f32 %v2358_v39, %v1188_v63  ;;  %v1192_v15 = vmul.f32 %v2344_v1, %v2137_v27  ;;  %v2655_v57 = vld [vmem:[#allocation20_spill] sm:$0xff] }
 0x261   : > { %1367 = vst [vmem:[#allocation7 + $0xa8] sm:$0xff] %v1303_v29  ;;  %v1316_v62 = vmax.f32 %v1252_v24, 0.0  ;;  %v1256_v45 = vadd.f32 %v2358_v39, %v1189_v3  ;;  %v1193_v19 = vmul.f32 %v2344_v1, %v2140_v31  ;;  %v1317_v30 = vmax.f32 %v1253_v4, 0.0  ;;  %v2663_v24 = vld [vmem:[#allocation27_spill] sm:$0xff] }
 0x262   : > { %1368 = vst [vmem:[#allocation7 + $0xb0] sm:$0xff] %v1304_v60  ;;  %v1257_v25 = vadd.f32 %v2358_v39, %v1190_v7  ;;  %v1194_v23 = vmul.f32 %v2344_v1, %v2143_v35  ;;  %v1318_v47 = vmax.f32 %v1254_v49, 0.0  ;;  %v1258_v32 = vadd.f32 %v2358_v39, %v1191_v11  ;;  %v2664_v7 = vld [vmem:[#allocation28_spill] sm:$0xff] }
 0x263   : > { %1369 = vst [vmem:[#allocation7 + $0xb8] sm:$0xff] %v1305_v14  ;;  %v1195_v27 = vmul.f32 %v2344_v1, %v2652_v0  ;;  %v1319_v56 = vmax.f32 %v1255_v28, 0.0  ;;  %v1259_v34 = vadd.f32 %v2358_v39, %v1192_v15  ;;  %v1196_v31 = vmul.f32 %v2344_v1, %v2653_v51 }
 0x264   : > { %1370 = vst [vmem:[#allocation7 + $0xc0] sm:$0xff] %v1306_v37  ;;  %v1320_v8 = vmax.f32 %v1256_v45, 0.0  ;;  %v1260_v36 = vadd.f32 %v2358_v39, %v1193_v19  ;;  %v1197_v35 = vmul.f32 %v2344_v1, %v2654_v10  ;;  %v1321_v13 = vmax.f32 %v1257_v25, 0.0  ;;  %v2666_v45 = vld [vmem:[#allocation30_spill] sm:$0xff] }
 0x265   : > { %1371 = vst [vmem:[#allocation7 + $0xc8] sm:$0xff] %v1307_v53  ;;  %v1261_v38 = vadd.f32 %v2358_v39, %v1194_v23  ;;  %v1198_v21 = vmul.f32 %v2344_v1, %v2655_v57  ;;  %v1322_v40 = vmax.f32 %v1258_v32, 0.0  ;;  %v1262_v29 = vadd.f32 %v2358_v39, %v1195_v27  ;;  %v2667_v23 = vld [vmem:[#allocation31_spill] sm:$0xff]  ;;  %v2668_v27 = vld [vmem:[#allocation32_spill] sm:$0xff] }
 0x266   : > { %1372 = vst [vmem:[#allocation7 + $0xd0] sm:$0xff] %v1308_v18  ;;  %v1199_v42 = vmul.f32 %v2344_v1, %v2656_v12  ;;  %v1323_v60 = vmax.f32 %v1259_v34, 0.0  ;;  %v1263_v33 = vadd.f32 %v2358_v39, %v1196_v31  ;;  %v1200_v14 = vmul.f32 %v2344_v1, %v2657_v44  ;;  %v2660_v18 = vld [vmem:[#allocation24_spill] sm:$0xff]  ;;  %v2669_v31 = vld [vmem:[#allocation33_spill] sm:$0xff] }
 0x267   : > { %1373 = vst [vmem:[#allocation7 + $0xd8] sm:$0xff] %v1309_v61  ;;  %v1214_v46 = vmul.f32 %v2344_v1, %v2658_v55  ;;  %v1324_v37 = vmax.f32 %v1260_v36, 0.0  ;;  %v1264_v16 = vadd.f32 %v2358_v39, %v1197_v35  ;;  %v1201_v53 = vmul.f32 %v2344_v1, %v2659_v48  ;;  %v2670_v35 = vld [vmem:[#allocation34_spill] sm:$0xff] }
 0x268   : > { %1374 = vst [vmem:[#allocation7 + $0xe0] sm:$0xff] %v1310_v9  ;;  %v1325_v43 = vmax.f32 %v1261_v38, 0.0  ;;  %v1265_v50 = vadd.f32 %v2358_v39, %v1198_v21  ;;  %v1202_v58 = vmul.f32 %v2344_v1, %v2660_v18  ;;  %v1326_v61 = vmax.f32 %v1262_v29, 0.0  ;;  %v2671_v21 = vld [vmem:[#allocation35_spill] sm:$0xff] }
 0x269   : > { %1375 = vst [vmem:[#allocation7 + $0xe8] sm:$0xff] %v1311_v22  ;;  %v2503_v52 = vadd.f32 %v2358_v39, %v1214_v46  ;;  %v1266_v20 = vadd.f32 %v2358_v39, %v1199_v42  ;;  %v1203_v9 = vmul.f32 %v2344_v1, %v2661_v54  ;;  %v1327_v5 = vmax.f32 %v1263_v33, 0.0  ;;  %v2662_v22 = vld [vmem:[#allocation26_spill] sm:$0xff] }
 0x26a   : > { %1376 = vst [vmem:[#allocation7 + $0xf0] sm:$0xff] %v1312_v41  ;;  %v1267_v59 = vadd.f32 %v2358_v39, %v1200_v14  ;;  %v1204_v17 = vmul.f32 %v2344_v1, %v2662_v22  ;;  %v1328_v63 = vmax.f32 %v1264_v16, 0.0  ;;  %v1268_v41 = vadd.f32 %v2358_v39, %v1201_v53 }
 0x26b   : > { %1377 = vst [vmem:[#allocation7 + $0xf8] sm:$0xff] %v1313_v2  ;;  %v1205_v3 = vmul.f32 %v2344_v1, %v2663_v24  ;;  %v1329_v2 = vmax.f32 %v1265_v50, 0.0  ;;  %v1269_v4 = vadd.f32 %v2358_v39, %v1202_v58  ;;  %v1330_v49 = vmax.f32 %v1266_v20, 0.0 }
 0x26c   : > { %1378 = vst [vmem:[#allocation7 + $0x100] sm:$0xff] %v1314_v26  ;;  %v1206_v26 = vmul.f32 %v2344_v1, %v2664_v7  ;;  %v1270_v11 = vadd.f32 %v2358_v39, %v1203_v9  ;;  %v1331_v15 = vmax.f32 %v1267_v59, 0.0  ;;  %v1208_v19 = vmul.f32 %v2344_v1, %v2666_v45 }
 0x26d   : > { %1379 = vst [vmem:[#allocation7 + $0x108] sm:$0xff] %v1315_v6  ;;  %v2665_v6 = vld [vmem:[#allocation29_spill] sm:$0xff]  ;;  %v1272_v25 = vadd.f32 %v2358_v39, %v1205_v3  ;;  %v1333_v32 = vmax.f32 %v1269_v4, 0.0  ;;  %v1345_v48 = vmax.f32 %v2503_v52, 0.0 }
 0x26e   : > { %1380 = vst [vmem:[#allocation7 + $0x110] sm:$0xff] %v1316_v62  ;;  %v1207_v28 = vmul.f32 %v2344_v1, %v2665_v6  ;;  %v1271_v62 = vadd.f32 %v2358_v39, %v1204_v17  ;;  %v1273_v0 = vadd.f32 %v2358_v39, %v1206_v26  ;;  %v1334_v34 = vmax.f32 %v1270_v11, 0.0 }
 0x26f   : > { %1381 = vst [vmem:[#allocation7 + $0x118] sm:$0xff] %v1317_v30  ;;  %v1332_v30 = vmax.f32 %v1268_v41, 0.0  ;;  %v1275_v10 = vadd.f32 %v2358_v39, %v1208_v19  ;;  %v1336_v38 = vmax.f32 %v1272_v25, 0.0 }
 0x270   : > { %1382 = vst [vmem:[#allocation7 + $0x120] sm:$0xff] %v1318_v47  ;;  %v1209_v47 = vmul.f32 %v2344_v1, %v2667_v23  ;;  %v1274_v51 = vadd.f32 %v2358_v39, %v1207_v28  ;;  %v1335_v36 = vmax.f32 %v1271_v62, 0.0  ;;  %v1337_v29 = vmax.f32 %v1273_v0, 0.0 }
 0x271   : > { %1383 = vst [vmem:[#allocation7 + $0x128] sm:$0xff] %v1319_v56  ;;  %v1210_v56 = vmul.f32 %v2344_v1, %v2668_v27  ;;  %v1339_v33 = vmax.f32 %v1275_v10, 0.0 }
 0x272   : > { %1384 = vst [vmem:[#allocation7 + $0x130] sm:$0xff] %v1320_v8  ;;  %v1211_v8 = vmul.f32 %v2344_v1, %v2669_v31  ;;  %v1276_v57 = vadd.f32 %v2358_v39, %v1209_v47  ;;  %v1338_v42 = vmax.f32 %v1274_v51, 0.0 }
 0x273   : > { %1385 = vst [vmem:[#allocation7 + $0x138] sm:$0xff] %v1321_v13  ;;  %v1212_v13 = vmul.f32 %v2344_v1, %v2670_v35  ;;  %v1277_v12 = vadd.f32 %v2358_v39, %v1210_v56 }
 0x274   : > { %1386 = vst [vmem:[#allocation7 + $0x140] sm:$0xff] %v1322_v40  ;;  %v1213_v40 = vmul.f32 %v2344_v1, %v2671_v21  ;;  %v1340_v14 = vmax.f32 %v1276_v57, 0.0 }
 0x275   : > { %1387 = vst [vmem:[#allocation7 + $0x148] sm:$0xff] %v1323_v60  ;;  %v1278_v60 = vadd.f32 %v2358_v39, %v1211_v8  ;;  %v1279_v44 = vadd.f32 %v2358_v39, %v1212_v13  ;;  %v1341_v46 = vmax.f32 %v1277_v12, 0.0 }
 0x276   : > { %1388 = vst [vmem:[#allocation7 + $0x150] sm:$0xff] %v1324_v37  ;;  %v1280_v55 = vadd.f32 %v2358_v39, %v1213_v40 }
 0x277   : > { %1389 = vst [vmem:[#allocation7 + $0x158] sm:$0xff] %v1325_v43  ;;  %v1342_v1 = vmax.f32 %v1278_v60, 0.0  ;;  %v1343_v37 = vmax.f32 %v1279_v44, 0.0 }
 0x278   : > { %1390 = vst [vmem:[#allocation7 + $0x160] sm:$0xff] %v1326_v61  ;;  %v1344_v16 = vmax.f32 %v1280_v55, 0.0 }
 0x279   : > { %1391 = vst [vmem:[#allocation7 + $0x168] sm:$0xff] %v1327_v5 }
 0x27a   : > { %1392 = vst [vmem:[#allocation7 + $0x170] sm:$0xff] %v1328_v63 }
 0x27b   : > { %1393 = vst [vmem:[#allocation7 + $0x178] sm:$0xff] %v1329_v2 }
 0x27c   : > { %1394 = vst [vmem:[#allocation7 + $0x180] sm:$0xff] %v1330_v49 }
 0x27d   : > { %1395 = vst [vmem:[#allocation7 + $0x188] sm:$0xff] %v1331_v15 }
 0x27e   : > { %1396 = vst [vmem:[#allocation7 + $0x190] sm:$0xff] %v1332_v30 }
 0x27f   : > { %1397 = vst [vmem:[#allocation7 + $0x198] sm:$0xff] %v1333_v32 }
 0x280   : > { %1398 = vst [vmem:[#allocation7 + $0x1a0] sm:$0xff] %v1334_v34 }
 0x281   : > { %1399 = vst [vmem:[#allocation7 + $0x1a8] sm:$0xff] %v1335_v36 }
 0x282   : > { %1400 = vst [vmem:[#allocation7 + $0x1b0] sm:$0xff] %v1336_v38 }
 0x283   : > { %1401 = vst [vmem:[#allocation7 + $0x1b8] sm:$0xff] %v1337_v29 }
 0x284   : > { %1402 = vst [vmem:[#allocation7 + $0x1c0] sm:$0xff] %v1338_v42 }
 0x285   : > { %1403 = vst [vmem:[#allocation7 + $0x1c8] sm:$0xff] %v1339_v33 }
 0x286   : > { %1404 = vst [vmem:[#allocation7 + $0x1d0] sm:$0xff] %v1340_v14 }
 0x287   : > { %1405 = vst [vmem:[#allocation7 + $0x1d8] sm:$0xff] %v1341_v46 }
 0x288   : > { %1406 = vst [vmem:[#allocation7 + $0x1e0] sm:$0xff] %v1342_v1 }
 0x289   : > { %1407 = vst [vmem:[#allocation7 + $0x1e8] sm:$0xff] %v1343_v37 }
 0x28a   : > { %1408 = vst [vmem:[#allocation7 + $0x1f0] sm:$0xff] %v1344_v16 }
 0x28b   : > { %1409 = vst [vmem:[#allocation7 + $0x1f8] sm:$0xff] %v1345_v48 }
 0x28c PF: > { %p1665_p4 = scmp.eq.s32.totalorder %s1889_s19, 1  ;;  %s1842_s14 = smov [#allocation7]  }
 0x28d   : > { %s1415_s15 = sshll.u32 %s1842_s14, 4  ;;  %s1417_s23 = sshll.u32 %s2564_s4, 4  ;;  %s1416_s15 = int_to_ptr.vmem [resolvable:$true] %s1415_s15  ;;  %s1418_s23 = int_to_ptr.hbm [resolvable:$true] %s1417_s23 }
 0x28e   : > { %s1843_s25 = smov 128   ;;  %s1844_s18 = smov 8  }
 0x28f   : > { %1651 = dma.vmem_to_hbm [thread:$0]  (%p1665_p4), %s1416_s15, 8192, %s1418_s23, [#allocation4], %s1843_s25, %s1843_s25, %s1844_s18  }
 0x290   : > { %1820 = dma.done.wait (%p1665_p4), [#allocation4], 8192  }
 0x291   : > { %1822 = vsyncadd (%p1665_p4), [#allocation4], 4294959104 }
 0x292 PF: > { %p16_p5 = scmp.ge.s32.totalorder %s1913_s27, 4   ;;  %s2672_s15 = smov %s1829_s16 }
 0x293   : > { %s2673_s16 = smov %s1833_s17  ;;  %s2674_s17 = smov %s1926_s6 }
 0x294   : > { %s2675_s18 = smov %s1913_s27  ;;  %18 = sbr.rel (!%p16_p5) target bundleno = 5 (0x5), region = 82 }
 0x299   :  { %1434 = vsyncpa [#allocation3], 1 }
 0x29a   :  { %1436 = vsyncpa [#allocation3 + $0x1], 1 }
 0x29b   :  { %1437 = vsyncpa [#allocation6], 1 }
 0x29c   :  { %1438 = vsyncpa [#allocation4], 1 }
 0x29d   :  { %1440 = vsyncpa [#allocation4 + $0x1], 1 }

</bundles_post_ra>
